<compile_context>
chip_gen: v7x
topology: tpu7x:2x2x1
jax: 0.10.0
libtpu: 0.0.40
codegen_flags: <defaults>
</compile_context>

<pallas_src>
import numpy as np
import jax
import jax.numpy as jnp
from jax.experimental import pallas as pl
from jax.experimental.pallas import tpu as pltpu

HIDDEN = 512
OUT_PAD = 128        # lane padding for the final Linear(512,1) on the MXU
NC_PAD = 128         # class-axis padding for the in-kernel one-hot gather
TILE_B_MAX = 1024    # per-tile batch rows (16-aligned); < 10 MiB of VMEM used
SPLIT_B = 256        # from this batch size on, use >= 2 tiles (v7x megacore)


def _leaky_relu(x, slope=0.2):
    return jnp.where(x > 0, x, slope * x)


def _round_up(x, m):
    return (x + m - 1) // m * m


def discriminator_kernel(x_ref, lab_ref, cbt_ref, b1_ref,
                         w1_ref,
                         w2_ref, b2_ref,
                         w3_ref, b3_ref,
                         w4_ref, b4_ref,
                         o_ref):
    tb = x_ref.shape[0]
    nc = cbt_ref.shape[0]

    # Layer 1 (image part): bf16 cast fused in-kernel, f32 accumulation.
    h = jnp.dot(x_ref[...].astype(jnp.bfloat16), w1_ref[...],
                preferred_element_type=jnp.float32)

    # Embedding contribution: gather rows of the per-class table (emb @ W1_emb)
    # via a tiny one-hot matmul (exact, since weights are exactly 0/1).
    classes = jax.lax.broadcasted_iota(jnp.int32, (tb, nc), 1)
    one_hot = jnp.where(classes == lab_ref[...], 1.0, 0.0).astype(jnp.bfloat16)
    h = h + jnp.dot(one_hot, cbt_ref[...], preferred_element_type=jnp.float32)
    h = _leaky_relu(h + b1_ref[...])                       # b1 added in f32

    # Layer 2: Linear(512,512) + Dropout(0.4) [eval: identity] + LeakyReLU(0.2)
    h = jnp.dot(h.astype(jnp.bfloat16), w2_ref[...],
                preferred_element_type=jnp.float32) + b2_ref[...]
    h = _leaky_relu(h)

    # Layer 3: Linear(512,512) + Dropout(0.4) [eval: identity] + LeakyReLU(0.2)
    h = jnp.dot(h.astype(jnp.bfloat16), w3_ref[...],
                preferred_element_type=jnp.float32) + b3_ref[...]
    h = _leaky_relu(h)

    # Layer 4: Linear(512,1), MXU-padded to 128 lanes; only the real logit
    # column is written back (4 B/sample instead of 512 B/sample).
    o = jnp.dot(h.astype(jnp.bfloat16), w4_ref[...],
                preferred_element_type=jnp.float32) + b4_ref[...]
    o_ref[...] = o[:, 0:1].astype(o_ref.dtype)


@jax.jit
def discriminator_forward(img, labels, params):
    """img: (B, C, H, W) float32 (NCHW, as in PyTorch); labels: (B,) int32."""
    B = img.shape[0]
    img_dim = int(np.prod(img.shape[1:]))
    x = img.reshape(B, img_dim).astype(jnp.float32)        # bf16 cast happens in-kernel
    lab = labels.astype(jnp.int32).reshape(B, 1)

    # Fold Embedding + W1's embedding slice into a small per-class table.
    w1 = params["w1"]
    num_classes = params["emb"].shape[0]
    nc_pad = max(NC_PAD, _round_up(num_classes, 128))
    cbt = (params["emb"] @ w1[img_dim:]).astype(jnp.bfloat16)        # (nc, 512)
    cbt_pad = jnp.zeros((nc_pad, HIDDEN), jnp.bfloat16).at[:num_classes].set(cbt)

    w1_img = w1[:img_dim].astype(jnp.bfloat16)                       # (img_dim, 512)
    w2 = params["w2"].astype(jnp.bfloat16)
    w3 = params["w3"].astype(jnp.bfloat16)
    w4_pad = (jnp.zeros((HIDDEN, OUT_PAD), jnp.float32)
              .at[:, :1].set(params["w4"]).astype(jnp.bfloat16))
    b4_pad = jnp.zeros((1, OUT_PAD), jnp.float32).at[:, :1].set(params["b4"])

    # Batch tiling: single full block when small; >=2 even, 16-aligned tiles
    # when B >= SPLIT_B so v7x's two TensorCores both get grid steps.
    if B < SPLIT_B:
        tile_b, b_pad, grid_b = B, B, 1
    else:
        n = max(2, -(-B // TILE_B_MAX))
        n += n % 2                               # even tile count for megacore
        tile_b = _round_up(-(-B // n), 16)
        b_pad = n * tile_b
        grid_b = n
    if b_pad != B:                               # ragged tail only; labels are tiny
        x = jnp.pad(x, ((0, b_pad - B), (0, 0)))
        lab = jnp.pad(lab, ((0, b_pad - B), (0, 0)))

    def tiled(d):
        return pl.BlockSpec((tile_b, d), lambda i: (i, 0))

    def resident(shape):  # resident operands: same block every grid step
        return pl.BlockSpec(shape, lambda i: (0, 0))

    flops = 2 * b_pad * (img_dim * HIDDEN + nc_pad * HIDDEN
                         + 2 * HIDDEN * HIDDEN + HIDDEN * OUT_PAD)
    bytes_accessed = (
        x.size * 4 + lab.size * 4 + b_pad * 4
        + (w1_img.size + w2.size + w3.size + w4_pad.size + cbt_pad.size) * 2
        + (params["b1"].size + params["b2"].size + params["b3"].size + OUT_PAD) * 4)

    out = pl.pallas_call(
        discriminator_kernel,
        out_shape=jax.ShapeDtypeStruct((b_pad, 1), jnp.float32),
        grid=(grid_b,),
        in_specs=[
            tiled(img_dim),                  # x (f32, cast to bf16 in-kernel)
            tiled(1),                        # labels (int32)
            resident((nc_pad, HIDDEN)),      # per-class table emb @ W1_emb (bf16)
            resident((1, HIDDEN)),           # b1 (f32)
            resident((img_dim, HIDDEN)),     # W1_img (bf16)
            resident((HIDDEN, HIDDEN)),      # W2 (bf16)
            resident((1, HIDDEN)),           # b2 (f32)
            resident((HIDDEN, HIDDEN)),      # W3 (bf16)
            resident((1, HIDDEN)),           # b3 (f32)
            resident((HIDDEN, OUT_PAD)),     # W4 padded (bf16)
            resident((1, OUT_PAD)),          # b4 padded (f32)
        ],
        out_specs=pl.BlockSpec((tile_b, 1), lambda i: (i, 0)),
        compiler_params=pltpu.CompilerParams(
            dimension_semantics=("parallel",),
            vmem_limit_bytes=48 * 1024 * 1024),
        cost_estimate=pl.CostEstimate(flops=flops, transcendentals=0,
                                      bytes_accessed=bytes_accessed),
    )(x, lab, cbt_pad, params["b1"], w1_img, w2, params["b2"],
      w3, params["b3"], w4_pad, b4_pad)

    return out[:B]


def init_params(key, num_classes, img_dim, hidden=HIDDEN):
    """Deterministic parameter init (PyTorch-Linear-style uniform ranges)."""
    D = num_classes + img_dim
    keys = jax.random.split(key, 9)

    def lin(kw, kb, fan_in, fan_out):
        bound = 1.0 / np.sqrt(fan_in)
        w = jax.random.uniform(kw, (fan_in, fan_out), jnp.float32, -bound, bound)
        b = jax.random.uniform(kb, (1, fan_out), jnp.float32, -bound, bound)
        return w, b

    emb = jax.random.normal(keys[0], (num_classes, num_classes), jnp.float32)
    w1, b1 = lin(keys[1], keys[2], D, hidden)
    w2, b2 = lin(keys[3], keys[4], hidden, hidden)
    w3, b3 = lin(keys[5], keys[6], hidden, hidden)
    w4, b4 = lin(keys[7], keys[8], hidden, 1)
    return dict(emb=emb, w1=w1, b1=b1, w2=w2, b2=b2, w3=w3, b3=b3, w4=w4, b4=b4)


def reference_forward(img, labels, params):
    """Pure-JAX reference mirroring the kernel's bf16 weight/activation
    quantization (f32 products/accumulation, as on the MXU)."""
    B = img.shape[0]
    img_dim = int(np.prod(img.shape[1:]))

    def q(a):
        return a.astype(jnp.bfloat16).astype(jnp.float32)

    img_flat = img.reshape(B, img_dim)
    w1 = params["w1"]
    cbt = q(params["emb"] @ w1[img_dim:])       # same bf16 table as the kernel
    h = q(img_flat) @ q(w1[:img_dim]) + jnp.take(cbt, labels, axis=0) + params["b1"]
    h = _leaky_relu(h)
    h = _leaky_relu(q(h) @ q(params["w2"]) + params["b2"])
    h = _leaky_relu(q(h) @ q(params["w3"]) + params["b3"])
    return q(h) @ q(params["w4"]) + params["b4"]


if __name__ == "__main__":
    # Small shapes consistent with the module: num_classes=10, img_shape=(1,16,16)
    B, num_classes = 2, 10
    img_shape = (1, 16, 16)
    img_dim = int(np.prod(img_shape))

    key = jax.random.PRNGKey(0)
    k_img, k_lbl, k_par = jax.random.split(key, 3)

    img = jax.random.normal(k_img, (B,) + img_shape, jnp.float32)       # NCHW
    labels = jax.random.randint(k_lbl, (B,), 0, num_classes, jnp.int32)
    params = init_params(k_par, num_classes, img_dim)

    out = jax.block_until_ready(discriminator_forward(img, labels, params))

    ref = reference_forward(img, labels, params)
    np.testing.assert_allclose(np.asarray(out), np.asarray(ref),
                               rtol=1e-3, atol=1e-3)

    assert out.shape == (B, 1)
    print("KERNEL_OK")
</pallas_src>

<mosaic_0001>
module attributes {stable_mosaic.version = 11 : i64} {
  func.func @discriminator_kernel(%arg0: i32, %arg1: memref<2x256xf32, #tpu.memory_space<vmem>>, %arg2: memref<2x1xi32, #tpu.memory_space<vmem>>, %arg3: memref<128x512xbf16, #tpu.memory_space<vmem>>, %arg4: memref<1x512xf32, #tpu.memory_space<vmem>>, %arg5: memref<256x512xbf16, #tpu.memory_space<vmem>>, %arg6: memref<512x512xbf16, #tpu.memory_space<vmem>>, %arg7: memref<1x512xf32, #tpu.memory_space<vmem>>, %arg8: memref<512x512xbf16, #tpu.memory_space<vmem>>, %arg9: memref<1x512xf32, #tpu.memory_space<vmem>>, %arg10: memref<512x128xbf16, #tpu.memory_space<vmem>>, %arg11: memref<1x128xf32, #tpu.memory_space<vmem>>, %arg12: memref<2x1xf32, #tpu.memory_space<vmem>>) attributes {dimension_semantics = [#tpu.dimension_semantics<parallel>], iteration_bounds = array<i64: 1>, scalar_prefetch = 0 : i64, scratch_operands = 0 : i64, tpu.core_type = #tpu.core_type<tc>, window_params = [{transform_indices = @transform_0, window_bounds = array<i64: 2, 256>}, {transform_indices = @transform_1, window_bounds = array<i64: 2, 1>}, {pipeline_mode = #tpu.pipeline_mode<synchronous>, transform_indices = @transform_2, window_bounds = array<i64: 128, 512>}, {pipeline_mode = #tpu.pipeline_mode<synchronous>, transform_indices = @transform_3, window_bounds = array<i64: 1, 512>}, {pipeline_mode = #tpu.pipeline_mode<synchronous>, transform_indices = @transform_4, window_bounds = array<i64: 256, 512>}, {pipeline_mode = #tpu.pipeline_mode<synchronous>, transform_indices = @transform_5, window_bounds = array<i64: 512, 512>}, {pipeline_mode = #tpu.pipeline_mode<synchronous>, transform_indices = @transform_6, window_bounds = array<i64: 1, 512>}, {pipeline_mode = #tpu.pipeline_mode<synchronous>, transform_indices = @transform_7, window_bounds = array<i64: 512, 512>}, {pipeline_mode = #tpu.pipeline_mode<synchronous>, transform_indices = @transform_8, window_bounds = array<i64: 1, 512>}, {pipeline_mode = #tpu.pipeline_mode<synchronous>, transform_indices = @transform_9, window_bounds = array<i64: 512, 128>}, {pipeline_mode = #tpu.pipeline_mode<synchronous>, transform_indices = @transform_10, window_bounds = array<i64: 1, 128>}, {transform_indices = @transform_11, window_bounds = array<i64: 2, 1>}]} {
    %c0 = arith.constant 0 : index
    %c0_0 = arith.constant 0 : index
    %0 = vector.load %arg1[%c0, %c0_0] : memref<2x256xf32, #tpu.memory_space<vmem>>, vector<2x256xf32>
    %1 = arith.truncf %0 : vector<2x256xf32> to vector<2x256xbf16>
    %c0_1 = arith.constant 0 : index
    %c0_2 = arith.constant 0 : index
    %2 = vector.load %arg5[%c0_1, %c0_2] : memref<256x512xbf16, #tpu.memory_space<vmem>>, vector<256x512xbf16>
    %cst = arith.constant dense<0.000000e+00> : vector<2x512xf32>
    %3 = tpu.matmul %1, %2, %cst {dimension_numbers = #tpu.dot_dimension_numbers<[1], [0], [0], [1], [0, 0, 1, 1], [], []>} : vector<2x256xbf16>, vector<256x512xbf16>, vector<2x512xf32> -> vector<2x512xf32>
    %4 = tpu.iota {dimensions = array<i32: 1>} : vector<2x128xi32>
    %c0_3 = arith.constant 0 : index
    %c0_4 = arith.constant 0 : index
    %5 = vector.load %arg2[%c0_3, %c0_4] : memref<2x1xi32, #tpu.memory_space<vmem>>, vector<2x1xi32>
    %6 = vector.broadcast %5 : vector<2x1xi32> to vector<2x128xi32>
    %7 = arith.cmpi eq, %4, %6 : vector<2x128xi32>
    %cst_5 = arith.constant 1.000000e+00 : f32
    %cst_6 = arith.constant 0.000000e+00 : f32
    %8 = vector.broadcast %cst_5 : f32 to vector<2x128xf32>
    %9 = vector.broadcast %cst_6 : f32 to vector<2x128xf32>
    %10 = arith.select %7, %8, %9 : vector<2x128xi1>, vector<2x128xf32>
    %11 = arith.truncf %10 : vector<2x128xf32> to vector<2x128xbf16>
    %c0_7 = arith.constant 0 : index
    %c0_8 = arith.constant 0 : index
    %12 = vector.load %arg3[%c0_7, %c0_8] : memref<128x512xbf16, #tpu.memory_space<vmem>>, vector<128x512xbf16>
    %cst_9 = arith.constant dense<0.000000e+00> : vector<2x512xf32>
    %13 = tpu.matmul %11, %12, %cst_9 {dimension_numbers = #tpu.dot_dimension_numbers<[1], [0], [0], [1], [0, 0, 1, 1], [], []>} : vector<2x128xbf16>, vector<128x512xbf16>, vector<2x512xf32> -> vector<2x512xf32>
    %14 = arith.addf %3, %13 : vector<2x512xf32>
    %c0_10 = arith.constant 0 : index
    %c0_11 = arith.constant 0 : index
    %15 = vector.load %arg4[%c0_10, %c0_11] : memref<1x512xf32, #tpu.memory_space<vmem>>, vector<1x512xf32>
    %16 = vector.broadcast %15 : vector<1x512xf32> to vector<2x512xf32>
    %17 = arith.addf %14, %16 : vector<2x512xf32>
    %cst_12 = arith.constant 0.000000e+00 : f32
    %18 = vector.broadcast %cst_12 : f32 to vector<2x512xf32>
    %19 = arith.cmpf ogt, %17, %18 : vector<2x512xf32>
    %cst_13 = arith.constant 2.000000e-01 : f32
    %20 = vector.broadcast %cst_13 : f32 to vector<2x512xf32>
    %21 = arith.mulf %20, %17 : vector<2x512xf32>
    %22 = arith.select %19, %17, %21 : vector<2x512xi1>, vector<2x512xf32>
    %23 = arith.truncf %22 : vector<2x512xf32> to vector<2x512xbf16>
    %c0_14 = arith.constant 0 : index
    %c0_15 = arith.constant 0 : index
    %24 = vector.load %arg6[%c0_14, %c0_15] : memref<512x512xbf16, #tpu.memory_space<vmem>>, vector<512x512xbf16>
    %cst_16 = arith.constant dense<0.000000e+00> : vector<2x512xf32>
    %25 = tpu.matmul %23, %24, %cst_16 {dimension_numbers = #tpu.dot_dimension_numbers<[1], [0], [0], [1], [0, 0, 1, 1], [], []>} : vector<2x512xbf16>, vector<512x512xbf16>, vector<2x512xf32> -> vector<2x512xf32>
    %c0_17 = arith.constant 0 : index
    %c0_18 = arith.constant 0 : index
    %26 = vector.load %arg7[%c0_17, %c0_18] : memref<1x512xf32, #tpu.memory_space<vmem>>, vector<1x512xf32>
    %27 = vector.broadcast %26 : vector<1x512xf32> to vector<2x512xf32>
    %28 = arith.addf %25, %27 : vector<2x512xf32>
    %cst_19 = arith.constant 0.000000e+00 : f32
    %29 = vector.broadcast %cst_19 : f32 to vector<2x512xf32>
    %30 = arith.cmpf ogt, %28, %29 : vector<2x512xf32>
    %cst_20 = arith.constant 2.000000e-01 : f32
    %31 = vector.broadcast %cst_20 : f32 to vector<2x512xf32>
    %32 = arith.mulf %31, %28 : vector<2x512xf32>
    %33 = arith.select %30, %28, %32 : vector<2x512xi1>, vector<2x512xf32>
    %34 = arith.truncf %33 : vector<2x512xf32> to vector<2x512xbf16>
    %c0_21 = arith.constant 0 : index
    %c0_22 = arith.constant 0 : index
    %35 = vector.load %arg8[%c0_21, %c0_22] : memref<512x512xbf16, #tpu.memory_space<vmem>>, vector<512x512xbf16>
    %cst_23 = arith.constant dense<0.000000e+00> : vector<2x512xf32>
    %36 = tpu.matmul %34, %35, %cst_23 {dimension_numbers = #tpu.dot_dimension_numbers<[1], [0], [0], [1], [0, 0, 1, 1], [], []>} : vector<2x512xbf16>, vector<512x512xbf16>, vector<2x512xf32> -> vector<2x512xf32>
    %c0_24 = arith.constant 0 : index
    %c0_25 = arith.constant 0 : index
    %37 = vector.load %arg9[%c0_24, %c0_25] : memref<1x512xf32, #tpu.memory_space<vmem>>, vector<1x512xf32>
    %38 = vector.broadcast %37 : vector<1x512xf32> to vector<2x512xf32>
    %39 = arith.addf %36, %38 : vector<2x512xf32>
    %cst_26 = arith.constant 0.000000e+00 : f32
    %40 = vector.broadcast %cst_26 : f32 to vector<2x512xf32>
    %41 = arith.cmpf ogt, %39, %40 : vector<2x512xf32>
    %cst_27 = arith.constant 2.000000e-01 : f32
    %42 = vector.broadcast %cst_27 : f32 to vector<2x512xf32>
    %43 = arith.mulf %42, %39 : vector<2x512xf32>
    %44 = arith.select %41, %39, %43 : vector<2x512xi1>, vector<2x512xf32>
    %45 = arith.truncf %44 : vector<2x512xf32> to vector<2x512xbf16>
    %c0_28 = arith.constant 0 : index
    %c0_29 = arith.constant 0 : index
    %46 = vector.load %arg10[%c0_28, %c0_29] : memref<512x128xbf16, #tpu.memory_space<vmem>>, vector<512x128xbf16>
    %cst_30 = arith.constant dense<0.000000e+00> : vector<2x128xf32>
    %47 = tpu.matmul %45, %46, %cst_30 {dimension_numbers = #tpu.dot_dimension_numbers<[1], [0], [0], [1], [0, 0, 1, 1], [], []>} : vector<2x512xbf16>, vector<512x128xbf16>, vector<2x128xf32> -> vector<2x128xf32>
    %c0_31 = arith.constant 0 : index
    %c0_32 = arith.constant 0 : index
    %48 = vector.load %arg11[%c0_31, %c0_32] : memref<1x128xf32, #tpu.memory_space<vmem>>, vector<1x128xf32>
    %49 = vector.broadcast %48 : vector<1x128xf32> to vector<2x128xf32>
    %50 = arith.addf %47, %49 : vector<2x128xf32>
    %51 = vector.extract_strided_slice %50 {offsets = [0, 0], sizes = [2, 1], strides = [1, 1]} : vector<2x128xf32> to vector<2x1xf32>
    %c0_33 = arith.constant 0 : index
    %c0_34 = arith.constant 0 : index
    %52 = vector.load %arg12[%c0_33, %c0_34] : memref<2x1xf32, #tpu.memory_space<vmem>>, vector<2x1xf32>
    tpu.vector_store %arg12[%c0_33, %c0_34], %51 {strides = array<i32>} : memref<2x1xf32, #tpu.memory_space<vmem>>, vector<2x1xf32>,
    return
  }
  func.func @transform_0(%arg0: i32) -> (i32, i32) {
    %c0_i32 = arith.constant 0 : i32
    %c0_i32_0 = arith.constant 0 : i32
    return %arg0, %c0_i32 : i32, i32
  }
  func.func @transform_1(%arg0: i32) -> (i32, i32) {
    %c0_i32 = arith.constant 0 : i32
    %c0_i32_0 = arith.constant 0 : i32
    return %arg0, %c0_i32 : i32, i32
  }
  func.func @transform_2(%arg0: i32) -> (i32, i32) {
    %c0_i32 = arith.constant 0 : i32
    %c0_i32_0 = arith.constant 0 : i32
    %c0_i32_1 = arith.constant 0 : i32
    return %c0_i32, %c0_i32_0 : i32, i32
  }
  func.func @transform_3(%arg0: i32) -> (i32, i32) {
    %c0_i32 = arith.constant 0 : i32
    %c0_i32_0 = arith.constant 0 : i32
    %c0_i32_1 = arith.constant 0 : i32
    return %c0_i32, %c0_i32_0 : i32, i32
  }
  func.func @transform_4(%arg0: i32) -> (i32, i32) {
    %c0_i32 = arith.constant 0 : i32
    %c0_i32_0 = arith.constant 0 : i32
    %c0_i32_1 = arith.constant 0 : i32
    return %c0_i32, %c0_i32_0 : i32, i32
  }
  func.func @transform_5(%arg0: i32) -> (i32, i32) {
    %c0_i32 = arith.constant 0 : i32
    %c0_i32_0 = arith.constant 0 : i32
    %c0_i32_1 = arith.constant 0 : i32
    return %c0_i32, %c0_i32_0 : i32, i32
  }
  func.func @transform_6(%arg0: i32) -> (i32, i32) {
    %c0_i32 = arith.constant 0 : i32
    %c0_i32_0 = arith.constant 0 : i32
    %c0_i32_1 = arith.constant 0 : i32
    return %c0_i32, %c0_i32_0 : i32, i32
  }
  func.func @transform_7(%arg0: i32) -> (i32, i32) {
    %c0_i32 = arith.constant 0 : i32
    %c0_i32_0 = arith.constant 0 : i32
    %c0_i32_1 = arith.constant 0 : i32
    return %c0_i32, %c0_i32_0 : i32, i32
  }
  func.func @transform_8(%arg0: i32) -> (i32, i32) {
    %c0_i32 = arith.constant 0 : i32
    %c0_i32_0 = arith.constant 0 : i32
    %c0_i32_1 = arith.constant 0 : i32
    return %c0_i32, %c0_i32_0 : i32, i32
  }
  func.func @transform_9(%arg0: i32) -> (i32, i32) {
    %c0_i32 = arith.constant 0 : i32
    %c0_i32_0 = arith.constant 0 : i32
    %c0_i32_1 = arith.constant 0 : i32
    return %c0_i32, %c0_i32_0 : i32, i32
  }
  func.func @transform_10(%arg0: i32) -> (i32, i32) {
    %c0_i32 = arith.constant 0 : i32
    %c0_i32_0 = arith.constant 0 : i32
    %c0_i32_1 = arith.constant 0 : i32
    return %c0_i32, %c0_i32_0 : i32, i32
  }
  func.func @transform_11(%arg0: i32) -> (i32, i32) {
    %c0_i32 = arith.constant 0 : i32
    %c0_i32_0 = arith.constant 0 : i32
    return %arg0, %c0_i32 : i32, i32
  }
}

</mosaic_0001>

<bundles_post_ra>
// kernel: discriminator_forward.1
= control target key start
LH: loop header
LB: loop body
LE: loop exit
PB: predicated region body
PF: predicated region fallthrough
CT: control target
= control target key end

     0   :  { %v4154_v0 = vmov 0   ;;  %v117_v36 = vlaneseq  ;;  %v4155_v46 = vmov 1.0|1.0   ;;  %vm3127_vm14 = vcmask 1024   ;;  %s5431_s1 = inlined_call_operand.vmem [shape: s32[2,1], index: 1, kind: input, shape index: {}]   ;;  %s5432_s2 = inlined_call_operand.vmem [shape: bf16[128,512], index: 2, kind: input, shape index: {}]   ;;  %s5433_s4 = inlined_call_operand.vmem [shape: bf16[256,512], index: 4, kind: input, shape index: {}]   ;;  %s5434_s0 = inlined_call_operand.vmem [shape: f32[2,256], index: 0, kind: input, shape index: {}]   ;;  %s5435_s5 = inlined_call_operand.vmem [shape: bf16[512,512], index: 5, kind: input, shape index: {}]   ;;  %s5436_s7 = inlined_call_operand.vmem [shape: bf16[512,512], index: 7, kind: input, shape index: {}]   ;;  %s5437_s3 = inlined_call_operand.vmem [shape: f32[1,512], index: 3, kind: input, shape index: {}]   ;;  %s5438_s9 = inlined_call_operand.vmem [shape: bf16[512,128], index: 9, kind: input, shape index: {}]   ;;  %s5439_s6 = inlined_call_operand.vmem [shape: f32[1,512], index: 6, kind: input, shape index: {}]   ;;  %s5440_s8 = inlined_call_operand.vmem [shape: f32[1,512], index: 8, kind: input, shape index: {}]   ;;  %s5441_s10 = inlined_call_operand.vmem [shape: f32[1,128], index: 10, kind: input, shape index: {}]   ;;  %s5442_s11 = inlined_call_operand.vmem [shape: f32[2,1], index: 11, kind: output, shape index: {}]  }
   0x1   :  { %3593 = vset.pattern.permute.xlu0 %v4154_v0  ;;  %v119_v1 = vld [vmem:[%s5431_s1] sm:$0x3]  ;;  %350 = vmatprep.mubr.bf16.mxu0 %v4154_v0  ;;  %v3594_v2 = vld [vmem:[%s5432_s2 + $0x4] ss:$16 sps:$4 sm:$0xff]   ;;  %v3596_v3 = vld [vmem:[%s5432_s2 + $0xc] ss:$16 sps:$4 sm:$0xff]  }
   0x2   :  { %121 = vperm.xlu0 %3593, %v119_v1   ;;  %391 = vmatprep.mubr.bf16.mxu1 %v4154_v0  ;;  %v3598_v4 = vld [vmem:[%s5432_s2] ss:$16 sps:$4 sm:$0xff]   ;;  %v3599_v5 = vld [vmem:[%s5432_s2 + $0x8] ss:$16 sps:$4 sm:$0xff]   ;;  %v3600_v6 = vld [vmem:[%s5432_s2 + $0x24] ss:$16 sps:$4 sm:$0xff]  }
   0x3   :  { %318 = vmatprep.subr.bf16.mxu0 %v3594_v2  ;;  %359 = vmatprep.subr.bf16.mxu1 %v3596_v3  ;;  %v3602_v7 = vld [vmem:[%s5432_s2 + $0x2c] ss:$16 sps:$4 sm:$0xff]   ;;  %v3604_v8 = vld [vmem:[%s5432_s2 + $0x20] ss:$16 sps:$4 sm:$0xff]   ;;  %v3605_v9 = vld [vmem:[%s5432_s2 + $0x28] ss:$16 sps:$4 sm:$0xff]  }
   0x4   :  { %319 = vmatpush1.bf16.msra.mxu0 %v3598_v4  ;;  %360 = vmatpush1.bf16.msra.mxu1 %v3599_v5  ;;  %v3606_v10 = vld [vmem:[%s5432_s2 + $0x44] ss:$16 sps:$4 sm:$0xff]   ;;  %v3608_v11 = vld [vmem:[%s5432_s2 + $0x4c] ss:$16 sps:$4 sm:$0xff]   ;;  %v3610_v12 = vld [vmem:[%s5432_s2 + $0x40] ss:$16 sps:$4 sm:$0xff]  }
   0x5   :  { %320 = vmatprep.subr.bf16.mxu0 %v3600_v6  ;;  %361 = vmatprep.subr.bf16.mxu1 %v3602_v7  ;;  %v3611_v13 = vld [vmem:[%s5432_s2 + $0x48] ss:$16 sps:$4 sm:$0xff]   ;;  %v3612_v14 = vld [vmem:[%s5432_s2 + $0x64] ss:$16 sps:$4 sm:$0xff]   ;;  %v3614_v15 = vld [vmem:[%s5432_s2 + $0x6c] ss:$16 sps:$4 sm:$0xff]  }
   0x6   :  { %v3616_v16 = vld [vmem:[%s5432_s2 + $0x60] ss:$16 sps:$4 sm:$0xff]   ;;  %v3617_v17 = vld [vmem:[%s5432_s2 + $0x68] ss:$16 sps:$4 sm:$0xff]   ;;  %v3618_v18 = vld [vmem:[%s5432_s2 + $0x84] ss:$16 sps:$4 sm:$0xff]  }
   0x7   :  { %v3620_v19 = vld [vmem:[%s5432_s2 + $0x8c] ss:$16 sps:$4 sm:$0xff]   ;;  %v3622_v20 = vld [vmem:[%s5432_s2 + $0x80] ss:$16 sps:$4 sm:$0xff]   ;;  %v3623_v21 = vld [vmem:[%s5432_s2 + $0x88] ss:$16 sps:$4 sm:$0xff]  }
   0x8   :  { %321 = vmatpush1.bf16.msra.mxu0 %v3604_v8  ;;  %362 = vmatpush1.bf16.msra.mxu1 %v3605_v9  ;;  %v3624_v22 = vld [vmem:[%s5432_s2 + $0xa4] ss:$16 sps:$4 sm:$0xff]   ;;  %v3626_v23 = vld [vmem:[%s5432_s2 + $0xac] ss:$16 sps:$4 sm:$0xff]   ;;  %v3628_v24 = vld [vmem:[%s5432_s2 + $0xa0] ss:$16 sps:$4 sm:$0xff]  }
   0x9   :  { %322 = vmatprep.subr.bf16.mxu0 %v3606_v10  ;;  %363 = vmatprep.subr.bf16.mxu1 %v3608_v11  ;;  %v3629_v25 = vld [vmem:[%s5432_s2 + $0xa8] ss:$16 sps:$4 sm:$0xff]   ;;  %v3630_v26 = vld [vmem:[%s5432_s2 + $0xc4] ss:$16 sps:$4 sm:$0xff]   ;;  %v3632_v27 = vld [vmem:[%s5432_s2 + $0xcc] ss:$16 sps:$4 sm:$0xff]  }
   0xa   :  { %v3634_v28 = vld [vmem:[%s5432_s2 + $0xc0] ss:$16 sps:$4 sm:$0xff]   ;;  %v3635_v29 = vld [vmem:[%s5432_s2 + $0xc8] ss:$16 sps:$4 sm:$0xff]   ;;  %v3636_v30 = vld [vmem:[%s5432_s2 + $0xe4] ss:$16 sps:$4 sm:$0xff]  }
   0xb   :  { %v3638_v31 = vld [vmem:[%s5432_s2 + $0xec] ss:$16 sps:$4 sm:$0xff]   ;;  %v3640_v32 = vld [vmem:[%s5432_s2 + $0xe0] ss:$16 sps:$4 sm:$0xff]   ;;  %v3641_v33 = vld [vmem:[%s5432_s2 + $0xe8] ss:$16 sps:$4 sm:$0xff]  }
   0xc   :  { %323 = vmatpush1.bf16.msra.mxu0 %v3610_v12  ;;  %364 = vmatpush1.bf16.msra.mxu1 %v3611_v13  ;;  %v3644_v34 = vld [vmem:[%s5433_s4 + $0x4] ss:$16 sps:$4 sm:$0xff]   ;;  %v3647_v35 = vld [vmem:[%s5433_s4 + $0xc] ss:$16 sps:$4 sm:$0xff]   ;;  %v118_v38 = vand.u32 127, %v117_v36 }
   0xd   :  { %324 = vmatprep.subr.bf16.mxu0 %v3612_v14  ;;  %365 = vmatprep.subr.bf16.mxu1 %v3614_v15  ;;  %v4324_v37 = vld.sshfl [vmem:[%s5434_s0] sm:$0x33 pattern:$0x76325410]  ;;  %v3645_v42 = vld [vmem:[%s5433_s4 + $0x8] ss:$16 sps:$4 sm:$0xff]  }
   0xe   :  { %v48_v39 = vcombine.high %v4324_v37, %v4324_v37  ;;  %v3642_v41 = vld [vmem:[%s5433_s4] ss:$16 sps:$4 sm:$0xff]   ;;  %v3650_v43 = vld [vmem:[%s5433_s4 + $0x24] ss:$16 sps:$4 sm:$0xff]   ;;  %v3653_v44 = vld [vmem:[%s5433_s4 + $0x2c] ss:$16 sps:$4 sm:$0xff]  }
   0xf   :  { %v3648_v47 = vld [vmem:[%s5433_s4 + $0x20] ss:$16 sps:$4 sm:$0xff]   ;;  %v3651_v48 = vld [vmem:[%s5433_s4 + $0x28] ss:$16 sps:$4 sm:$0xff]   ;;  %v3656_v49 = vld [vmem:[%s5433_s4 + $0x44] ss:$16 sps:$4 sm:$0xff]  }
  0x10   :  { %325 = vmatpush1.bf16.msra.mxu0 %v3616_v16  ;;  %366 = vmatpush1.bf16.msra.mxu1 %v3617_v17  ;;  %v52_v45 = vpack.c.bf16 %v48_v39, %v48_v39  ;;  %v3659_v50 = vld [vmem:[%s5433_s4 + $0x4c] ss:$16 sps:$4 sm:$0xff]   ;;  %v3654_v51 = vld [vmem:[%s5433_s4 + $0x40] ss:$16 sps:$4 sm:$0xff]   ;;  %v3657_v52 = vld [vmem:[%s5433_s4 + $0x48] ss:$16 sps:$4 sm:$0xff]  }
  0x11   :  { %326 = vmatprep.subr.bf16.mxu0 %v3618_v18  ;;  %367 = vmatprep.subr.bf16.mxu1 %v3620_v19  ;;  %v3662_v53 = vld [vmem:[%s5433_s4 + $0x64] ss:$16 sps:$4 sm:$0xff]   ;;  %v3665_v54 = vld [vmem:[%s5433_s4 + $0x6c] ss:$16 sps:$4 sm:$0xff]   ;;  %v3660_v55 = vld [vmem:[%s5433_s4 + $0x60] ss:$16 sps:$4 sm:$0xff]  }
  0x12   :  { %v3663_v56 = vld [vmem:[%s5433_s4 + $0x68] ss:$16 sps:$4 sm:$0xff]   ;;  %v3668_v57 = vld [vmem:[%s5433_s4 + $0x84] ss:$16 sps:$4 sm:$0xff]   ;;  %v3671_v58 = vld [vmem:[%s5433_s4 + $0x8c] ss:$16 sps:$4 sm:$0xff]  }
  0x13   :  { %v3666_v59 = vld [vmem:[%s5433_s4 + $0x80] ss:$16 sps:$4 sm:$0xff]   ;;  %v3669_v60 = vld [vmem:[%s5433_s4 + $0x88] ss:$16 sps:$4 sm:$0xff]   ;;  %v3674_v61 = vld [vmem:[%s5433_s4 + $0xa4] ss:$16 sps:$4 sm:$0xff]  }
  0x14   :  { %327 = vmatpush1.bf16.msra.mxu0 %v3622_v20  ;;  %368 = vmatpush1.bf16.msra.mxu1 %v3623_v21  ;;  %v3677_v62 = vld [vmem:[%s5433_s4 + $0xac] ss:$16 sps:$4 sm:$0xff]   ;;  %v3672_v63 = vld [vmem:[%s5433_s4 + $0xa0] ss:$16 sps:$4 sm:$0xff]   ;;  %v3675_v0 = vld [vmem:[%s5433_s4 + $0xa8] ss:$16 sps:$4 sm:$0xff]  }
  0x15   :  { %328 = vmatprep.subr.bf16.mxu0 %v3624_v22  ;;  %369 = vmatprep.subr.bf16.mxu1 %v3626_v23  ;;  %v3680_v1 = vld [vmem:[%s5433_s4 + $0xc4] ss:$16 sps:$4 sm:$0xff]   ;;  %v3683_v2 = vld [vmem:[%s5433_s4 + $0xcc] ss:$16 sps:$4 sm:$0xff]   ;;  %v3678_v3 = vld [vmem:[%s5433_s4 + $0xc0] ss:$16 sps:$4 sm:$0xff]  }
  0x16   :  { %v3681_v4 = vld [vmem:[%s5433_s4 + $0xc8] ss:$16 sps:$4 sm:$0xff]   ;;  %v3686_v5 = vld [vmem:[%s5433_s4 + $0xe4] ss:$16 sps:$4 sm:$0xff]   ;;  %v3689_v6 = vld [vmem:[%s5433_s4 + $0xec] ss:$16 sps:$4 sm:$0xff]  }
  0x17   :  { %v3684_v7 = vld [vmem:[%s5433_s4 + $0xe0] ss:$16 sps:$4 sm:$0xff]   ;;  %v3687_v8 = vld [vmem:[%s5433_s4 + $0xe8] ss:$16 sps:$4 sm:$0xff]   ;;  %v3692_v9 = vld [vmem:[%s5433_s4 + $0x104] ss:$16 sps:$4 sm:$0xff]  }
  0x18   :  { %329 = vmatpush1.bf16.msra.mxu0 %v3628_v24  ;;  %370 = vmatpush1.bf16.msra.mxu1 %v3629_v25  ;;  %v3695_v10 = vld [vmem:[%s5433_s4 + $0x10c] ss:$16 sps:$4 sm:$0xff]   ;;  %v3690_v11 = vld [vmem:[%s5433_s4 + $0x100] ss:$16 sps:$4 sm:$0xff]   ;;  %v3693_v12 = vld [vmem:[%s5433_s4 + $0x108] ss:$16 sps:$4 sm:$0xff]  }
  0x19   :  { %330 = vmatprep.subr.bf16.mxu0 %v3630_v26  ;;  %371 = vmatprep.subr.bf16.mxu1 %v3632_v27  ;;  %v3698_v13 = vld [vmem:[%s5433_s4 + $0x124] ss:$16 sps:$4 sm:$0xff]   ;;  %v3701_v14 = vld [vmem:[%s5433_s4 + $0x12c] ss:$16 sps:$4 sm:$0xff]   ;;  %v3696_v15 = vld [vmem:[%s5433_s4 + $0x120] ss:$16 sps:$4 sm:$0xff]  }
  0x1a   :  { %v3699_v16 = vld [vmem:[%s5433_s4 + $0x128] ss:$16 sps:$4 sm:$0xff]   ;;  %v3704_v17 = vld [vmem:[%s5433_s4 + $0x144] ss:$16 sps:$4 sm:$0xff]   ;;  %v3707_v18 = vld [vmem:[%s5433_s4 + $0x14c] ss:$16 sps:$4 sm:$0xff]  }
  0x1b   :  { %v3702_v19 = vld [vmem:[%s5433_s4 + $0x140] ss:$16 sps:$4 sm:$0xff]   ;;  %v3705_v20 = vld [vmem:[%s5433_s4 + $0x148] ss:$16 sps:$4 sm:$0xff]   ;;  %v3710_v21 = vld [vmem:[%s5433_s4 + $0x164] ss:$16 sps:$4 sm:$0xff]  }
  0x1c   :  { %331 = vmatpush1.bf16.msra.mxu0 %v3634_v28  ;;  %372 = vmatpush1.bf16.msra.mxu1 %v3635_v29  ;;  %v3713_v22 = vld [vmem:[%s5433_s4 + $0x16c] ss:$16 sps:$4 sm:$0xff]   ;;  %v3708_v23 = vld [vmem:[%s5433_s4 + $0x160] ss:$16 sps:$4 sm:$0xff]   ;;  %v3711_v24 = vld [vmem:[%s5433_s4 + $0x168] ss:$16 sps:$4 sm:$0xff]  }
  0x1d   :  { %332 = vmatprep.subr.bf16.mxu0 %v3636_v30  ;;  %373 = vmatprep.subr.bf16.mxu1 %v3638_v31  ;;  %v3716_v25 = vld [vmem:[%s5433_s4 + $0x184] ss:$16 sps:$4 sm:$0xff]   ;;  %v3719_v26 = vld [vmem:[%s5433_s4 + $0x18c] ss:$16 sps:$4 sm:$0xff]   ;;  %v3714_v27 = vld [vmem:[%s5433_s4 + $0x180] ss:$16 sps:$4 sm:$0xff]  }
  0x1e   :  { %v3717_v28 = vld [vmem:[%s5433_s4 + $0x188] ss:$16 sps:$4 sm:$0xff]   ;;  %v3722_v29 = vld [vmem:[%s5433_s4 + $0x1a4] ss:$16 sps:$4 sm:$0xff]   ;;  %v3725_v30 = vld [vmem:[%s5433_s4 + $0x1ac] ss:$16 sps:$4 sm:$0xff]  }
  0x1f   :  { %v3720_v31 = vld [vmem:[%s5433_s4 + $0x1a0] ss:$16 sps:$4 sm:$0xff]   ;;  %v3734_v39 = vld [vmem:[%s5433_s4 + $0x1e4] ss:$16 sps:$4 sm:$0xff]  }
  0x20   :  { %333 = vmatpush1.bf16.msra.mxu0 %v3640_v32  ;;  %374 = vmatpush1.bf16.msra.mxu1 %v3641_v33  ;;  %v3723_v32 = vld [vmem:[%s5433_s4 + $0x1a8] ss:$16 sps:$4 sm:$0xff]   ;;  %v3728_v33 = vld [vmem:[%s5433_s4 + $0x1c4] ss:$16 sps:$4 sm:$0xff]  }
  0x21   :  { %720 = vmatprep.subr.bf16.mxu0 %v3644_v34  ;;  %761 = vmatprep.subr.bf16.mxu1 %v3647_v35  ;;  %v3731_v34 = vld [vmem:[%s5433_s4 + $0x1cc] ss:$16 sps:$4 sm:$0xff]   ;;  %v3726_v35 = vld [vmem:[%s5433_s4 + $0x1c0] ss:$16 sps:$4 sm:$0xff]  }
  0x81   :  { %v122_v40 = vpop.permute.xlu0 %121 }
  0x82   :  { %vm123_vm0 = vcmp.eq.s32.totalorder %v118_v38, %v122_v40  ;;  %v3729_v38 = vld [vmem:[%s5433_s4 + $0x1c8] ss:$16 sps:$4 sm:$0xff]   ;;  %v3737_v40 = vld [vmem:[%s5433_s4 + $0x1ec] ss:$16 sps:$4 sm:$0xff]  }
  0x83   :  { %vm3166_vm1 = vmpackc.low %vm123_vm0, %vm123_vm0 }
  0x84   :  { %3167 = vmatmul.mubr.msk.bf16.vlgmr.msra.gmra.mrb[0].mxu0 %vm3166_vm1, %v4155_v46  ;;  %3169 = vmatmul.mubr.msk.bf16.vlgmr.msra.gmra.mrb[0].mxu1 %vm3166_vm1, %v4155_v46  ;;  %v3741_v46 = vld [vmem:[%s5435_s5 + $0x8] ss:$16 sps:$4 sm:$0xff]  }
  0x85   :  { %721 = vmatpush1.bf16.msra.mxu0 %v3642_v41  ;;  %762 = vmatpush1.bf16.msra.mxu1 %v3645_v42  ;;  %v3732_v41 = vld [vmem:[%s5433_s4 + $0x1e0] ss:$16 sps:$4 sm:$0xff]   ;;  %v3735_v42 = vld [vmem:[%s5433_s4 + $0x1e8] ss:$16 sps:$4 sm:$0xff]  }
  0x86   :  { %722 = vmatprep.subr.bf16.mxu0 %v3650_v43  ;;  %763 = vmatprep.subr.bf16.mxu1 %v3653_v44  ;;  %v51_v43 = vpack.c.bf16 %v4324_v37, %v4324_v37  ;;  %v3738_v44 = vld [vmem:[%s5435_s5] ss:$16 sps:$4 sm:$0xff]   ;;  %v3743_v37 = vld [vmem:[%s5435_s5 + $0xc] ss:$16 sps:$4 sm:$0xff]  }
  0x87   :  { %752 = vmatprep.mubr.bf16.mxu0 %v52_v45  ;;  %793 = vmatprep.mubr.bf16.mxu1 %v52_v45  ;;  %v3740_v45 = vld [vmem:[%s5435_s5 + $0x4] ss:$16 sps:$4 sm:$0xff]  }
  0x89   :  { %723 = vmatpush1.bf16.msra.mxu0 %v3648_v47  ;;  %764 = vmatpush1.bf16.msra.mxu1 %v3651_v48  ;;  %v3744_v47 = vld [vmem:[%s5435_s5 + $0x20] ss:$16 sps:$4 sm:$0xff]   ;;  %v3746_v48 = vld [vmem:[%s5435_s5 + $0x24] ss:$16 sps:$4 sm:$0xff]  }
  0x8a   :  { %724 = vmatprep.subr.bf16.mxu0 %v3656_v49  ;;  %765 = vmatprep.subr.bf16.mxu1 %v3659_v50  ;;  %v3747_v49 = vld [vmem:[%s5435_s5 + $0x28] ss:$16 sps:$4 sm:$0xff]   ;;  %v3749_v50 = vld [vmem:[%s5435_s5 + $0x2c] ss:$16 sps:$4 sm:$0xff]  }
  0x8d   :  { %725 = vmatpush1.bf16.msra.mxu0 %v3654_v51  ;;  %766 = vmatpush1.bf16.msra.mxu1 %v3657_v52  ;;  %v3752_v51 = vld [vmem:[%s5435_s5 + $0x44] ss:$16 sps:$4 sm:$0xff]   ;;  %v3750_v52 = vld [vmem:[%s5435_s5 + $0x40] ss:$16 sps:$4 sm:$0xff]  }
  0x8e   :  { %726 = vmatprep.subr.bf16.mxu0 %v3662_v53  ;;  %767 = vmatprep.subr.bf16.mxu1 %v3665_v54  ;;  %v3755_v53 = vld [vmem:[%s5435_s5 + $0x4c] ss:$16 sps:$4 sm:$0xff]   ;;  %v3753_v54 = vld [vmem:[%s5435_s5 + $0x48] ss:$16 sps:$4 sm:$0xff]  }
  0x91   :  { %727 = vmatpush1.bf16.msra.mxu0 %v3660_v55  ;;  %768 = vmatpush1.bf16.msra.mxu1 %v3663_v56  ;;  %v3758_v55 = vld [vmem:[%s5435_s5 + $0x64] ss:$16 sps:$4 sm:$0xff]   ;;  %v3761_v56 = vld [vmem:[%s5435_s5 + $0x6c] ss:$16 sps:$4 sm:$0xff]  }
  0x92   :  { %728 = vmatprep.subr.bf16.mxu0 %v3668_v57  ;;  %769 = vmatprep.subr.bf16.mxu1 %v3671_v58  ;;  %v3756_v57 = vld [vmem:[%s5435_s5 + $0x60] ss:$16 sps:$4 sm:$0xff]   ;;  %v3759_v58 = vld [vmem:[%s5435_s5 + $0x68] ss:$16 sps:$4 sm:$0xff]  }
  0x95   :  { %729 = vmatpush1.bf16.msra.mxu0 %v3666_v59  ;;  %770 = vmatpush1.bf16.msra.mxu1 %v3669_v60  ;;  %v3764_v59 = vld [vmem:[%s5435_s5 + $0x84] ss:$16 sps:$4 sm:$0xff]   ;;  %v3767_v60 = vld [vmem:[%s5435_s5 + $0x8c] ss:$16 sps:$4 sm:$0xff]  }
  0x96   :  { %730 = vmatprep.subr.bf16.mxu0 %v3674_v61  ;;  %771 = vmatprep.subr.bf16.mxu1 %v3677_v62  ;;  %v3762_v61 = vld [vmem:[%s5435_s5 + $0x80] ss:$16 sps:$4 sm:$0xff]   ;;  %v3765_v62 = vld [vmem:[%s5435_s5 + $0x88] ss:$16 sps:$4 sm:$0xff]  }
  0x99   :  { %731 = vmatpush1.bf16.msra.mxu0 %v3672_v63  ;;  %772 = vmatpush1.bf16.msra.mxu1 %v3675_v0  ;;  %v3770_v63 = vld [vmem:[%s5435_s5 + $0xa4] ss:$16 sps:$4 sm:$0xff]   ;;  %v3773_v0 = vld [vmem:[%s5435_s5 + $0xac] ss:$16 sps:$4 sm:$0xff]  }
  0x9a   :  { %732 = vmatprep.subr.bf16.mxu0 %v3680_v1  ;;  %773 = vmatprep.subr.bf16.mxu1 %v3683_v2  ;;  %v3768_v1 = vld [vmem:[%s5435_s5 + $0xa0] ss:$16 sps:$4 sm:$0xff]   ;;  %v3771_v2 = vld [vmem:[%s5435_s5 + $0xa8] ss:$16 sps:$4 sm:$0xff]  }
  0x9d   :  { %733 = vmatpush1.bf16.msra.mxu0 %v3678_v3  ;;  %774 = vmatpush1.bf16.msra.mxu1 %v3681_v4  ;;  %v3776_v3 = vld [vmem:[%s5435_s5 + $0xc4] ss:$16 sps:$4 sm:$0xff]   ;;  %v3779_v4 = vld [vmem:[%s5435_s5 + $0xcc] ss:$16 sps:$4 sm:$0xff]  }
  0x9e   :  { %734 = vmatprep.subr.bf16.mxu0 %v3686_v5  ;;  %775 = vmatprep.subr.bf16.mxu1 %v3689_v6  ;;  %v3774_v5 = vld [vmem:[%s5435_s5 + $0xc0] ss:$16 sps:$4 sm:$0xff]   ;;  %v3777_v6 = vld [vmem:[%s5435_s5 + $0xc8] ss:$16 sps:$4 sm:$0xff]  }
  0xa1   :  { %735 = vmatpush1.bf16.msra.mxu0 %v3684_v7  ;;  %776 = vmatpush1.bf16.msra.mxu1 %v3687_v8  ;;  %v3782_v7 = vld [vmem:[%s5435_s5 + $0xe4] ss:$16 sps:$4 sm:$0xff]   ;;  %v3785_v8 = vld [vmem:[%s5435_s5 + $0xec] ss:$16 sps:$4 sm:$0xff]  }
  0xa2   :  { %736 = vmatprep.subr.bf16.mxu0 %v3692_v9  ;;  %777 = vmatprep.subr.bf16.mxu1 %v3695_v10  ;;  %v3780_v9 = vld [vmem:[%s5435_s5 + $0xe0] ss:$16 sps:$4 sm:$0xff]   ;;  %v3783_v10 = vld [vmem:[%s5435_s5 + $0xe8] ss:$16 sps:$4 sm:$0xff]  }
  0xa5   :  { %737 = vmatpush1.bf16.msra.mxu0 %v3690_v11  ;;  %778 = vmatpush1.bf16.msra.mxu1 %v3693_v12  ;;  %v3788_v11 = vld [vmem:[%s5435_s5 + $0x104] ss:$16 sps:$4 sm:$0xff]   ;;  %v3791_v12 = vld [vmem:[%s5435_s5 + $0x10c] ss:$16 sps:$4 sm:$0xff]  }
  0xa6   :  { %738 = vmatprep.subr.bf16.mxu0 %v3698_v13  ;;  %779 = vmatprep.subr.bf16.mxu1 %v3701_v14  ;;  %v3786_v13 = vld [vmem:[%s5435_s5 + $0x100] ss:$16 sps:$4 sm:$0xff]   ;;  %v3789_v14 = vld [vmem:[%s5435_s5 + $0x108] ss:$16 sps:$4 sm:$0xff]  }
  0xa9   :  { %739 = vmatpush1.bf16.msra.mxu0 %v3696_v15  ;;  %780 = vmatpush1.bf16.msra.mxu1 %v3699_v16  ;;  %v3794_v15 = vld [vmem:[%s5435_s5 + $0x124] ss:$16 sps:$4 sm:$0xff]   ;;  %v3797_v16 = vld [vmem:[%s5435_s5 + $0x12c] ss:$16 sps:$4 sm:$0xff]  }
  0xaa   :  { %740 = vmatprep.subr.bf16.mxu0 %v3704_v17  ;;  %781 = vmatprep.subr.bf16.mxu1 %v3707_v18  ;;  %v3792_v17 = vld [vmem:[%s5435_s5 + $0x120] ss:$16 sps:$4 sm:$0xff]   ;;  %v3795_v18 = vld [vmem:[%s5435_s5 + $0x128] ss:$16 sps:$4 sm:$0xff]  }
  0xad   :  { %741 = vmatpush1.bf16.msra.mxu0 %v3702_v19  ;;  %782 = vmatpush1.bf16.msra.mxu1 %v3705_v20  ;;  %v3800_v19 = vld [vmem:[%s5435_s5 + $0x144] ss:$16 sps:$4 sm:$0xff]   ;;  %v3803_v20 = vld [vmem:[%s5435_s5 + $0x14c] ss:$16 sps:$4 sm:$0xff]  }
  0xae   :  { %742 = vmatprep.subr.bf16.mxu0 %v3710_v21  ;;  %783 = vmatprep.subr.bf16.mxu1 %v3713_v22  ;;  %v3798_v21 = vld [vmem:[%s5435_s5 + $0x140] ss:$16 sps:$4 sm:$0xff]   ;;  %v3801_v22 = vld [vmem:[%s5435_s5 + $0x148] ss:$16 sps:$4 sm:$0xff]  }
  0xb1   :  { %743 = vmatpush1.bf16.msra.mxu0 %v3708_v23  ;;  %784 = vmatpush1.bf16.msra.mxu1 %v3711_v24  ;;  %v3806_v23 = vld [vmem:[%s5435_s5 + $0x164] ss:$16 sps:$4 sm:$0xff]   ;;  %v3809_v24 = vld [vmem:[%s5435_s5 + $0x16c] ss:$16 sps:$4 sm:$0xff]  }
  0xb2   :  { %744 = vmatprep.subr.bf16.mxu0 %v3716_v25  ;;  %785 = vmatprep.subr.bf16.mxu1 %v3719_v26  ;;  %v3804_v25 = vld [vmem:[%s5435_s5 + $0x160] ss:$16 sps:$4 sm:$0xff]   ;;  %v3807_v26 = vld [vmem:[%s5435_s5 + $0x168] ss:$16 sps:$4 sm:$0xff]  }
  0xb5   :  { %745 = vmatpush1.bf16.msra.mxu0 %v3714_v27  ;;  %786 = vmatpush1.bf16.msra.mxu1 %v3717_v28  ;;  %v3812_v27 = vld [vmem:[%s5435_s5 + $0x184] ss:$16 sps:$4 sm:$0xff]   ;;  %v3815_v28 = vld [vmem:[%s5435_s5 + $0x18c] ss:$16 sps:$4 sm:$0xff]  }
  0xb6   :  { %746 = vmatprep.subr.bf16.mxu0 %v3722_v29  ;;  %787 = vmatprep.subr.bf16.mxu1 %v3725_v30  ;;  %v3810_v29 = vld [vmem:[%s5435_s5 + $0x180] ss:$16 sps:$4 sm:$0xff]   ;;  %v3813_v30 = vld [vmem:[%s5435_s5 + $0x188] ss:$16 sps:$4 sm:$0xff]  }
  0xb9   :  { %747 = vmatpush1.bf16.msra.mxu0 %v3720_v31  ;;  %788 = vmatpush1.bf16.msra.mxu1 %v3723_v32  ;;  %v3818_v31 = vld [vmem:[%s5435_s5 + $0x1a4] ss:$16 sps:$4 sm:$0xff]   ;;  %v3821_v32 = vld [vmem:[%s5435_s5 + $0x1ac] ss:$16 sps:$4 sm:$0xff]  }
  0xba   :  { %748 = vmatprep.subr.bf16.mxu0 %v3728_v33  ;;  %789 = vmatprep.subr.bf16.mxu1 %v3731_v34  ;;  %v3816_v33 = vld [vmem:[%s5435_s5 + $0x1a0] ss:$16 sps:$4 sm:$0xff]   ;;  %v3819_v34 = vld [vmem:[%s5435_s5 + $0x1a8] ss:$16 sps:$4 sm:$0xff]  }
  0xbd   :  { %749 = vmatpush1.bf16.msra.mxu0 %v3726_v35  ;;  %790 = vmatpush1.bf16.msra.mxu1 %v3729_v38  ;;  %v3824_v35 = vld [vmem:[%s5435_s5 + $0x1c4] ss:$16 sps:$4 sm:$0xff]   ;;  %v3827_v38 = vld [vmem:[%s5435_s5 + $0x1cc] ss:$16 sps:$4 sm:$0xff]  }
  0xbe   :  { %750 = vmatprep.subr.bf16.mxu0 %v3734_v39  ;;  %791 = vmatprep.subr.bf16.mxu1 %v3737_v40  ;;  %v3822_v39 = vld [vmem:[%s5435_s5 + $0x1c0] ss:$16 sps:$4 sm:$0xff]   ;;  %v3825_v40 = vld [vmem:[%s5435_s5 + $0x1c8] ss:$16 sps:$4 sm:$0xff]  }
  0xc1   :  { %751 = vmatpush1.bf16.msra.mxu0 %v3732_v41  ;;  %792 = vmatpush1.bf16.msra.mxu1 %v3735_v42  ;;  %v3830_v41 = vld [vmem:[%s5435_s5 + $0x1e4] ss:$16 sps:$4 sm:$0xff]   ;;  %v3833_v42 = vld [vmem:[%s5435_s5 + $0x1ec] ss:$16 sps:$4 sm:$0xff]  }
  0xc2   :  { %1634 = vmatprep.subr.bf16.mxu0 %v3740_v45  ;;  %1716 = vmatprep.subr.bf16.mxu1 %v3743_v37  ;;  %v3836_v45 = vld [vmem:[%s5435_s5 + $0x204] ss:$16 sps:$4 sm:$0xff]  }
  0xc4   :  { %753 = vmatmul.mubr.bf16.vlgmr.msra.gmra.mrb[4].mxu0 %v51_v43  ;;  %794 = vmatmul.mubr.bf16.vlgmr.msra.gmra.mrb[4].mxu1 %v51_v43  ;;  %v3828_v43 = vld [vmem:[%s5435_s5 + $0x1e0] ss:$16 sps:$4 sm:$0xff]  }
  0xc5   :  { %1635 = vmatpush1.bf16.msra.mxu0 %v3738_v44  ;;  %1717 = vmatpush1.bf16.msra.mxu1 %v3741_v46  ;;  %v3831_v44 = vld [vmem:[%s5435_s5 + $0x1e8] ss:$16 sps:$4 sm:$0xff]   ;;  %v3839_v46 = vld [vmem:[%s5435_s5 + $0x20c] ss:$16 sps:$4 sm:$0xff]  }
  0xc6   :  { %1636 = vmatprep.subr.bf16.mxu0 %v3746_v48  ;;  %1718 = vmatprep.subr.bf16.mxu1 %v3749_v50 }
  0xc9   :  { %1637 = vmatpush1.bf16.msra.mxu0 %v3744_v47  ;;  %1719 = vmatpush1.bf16.msra.mxu1 %v3747_v49 }
  0xca   :  { %1638 = vmatprep.subr.bf16.mxu0 %v3752_v51  ;;  %1720 = vmatprep.subr.bf16.mxu1 %v3755_v53 }
  0xcd   :  { %1639 = vmatpush1.bf16.msra.mxu0 %v3750_v52  ;;  %1721 = vmatpush1.bf16.msra.mxu1 %v3753_v54  ;;  %v805_v54 = vshrl.u32 %v117_v36, 7 }
  0xce   :  { %1640 = vmatprep.subr.bf16.mxu0 %v3758_v55  ;;  %1722 = vmatprep.subr.bf16.mxu1 %v3761_v56  ;;  %v802_v55 = vld [vmem:[%s5437_s3] sm:$0xf] }
  0xcf   :  { %v4719_v56 = vsub.s32 0, %v805_v54 }
  0xd1   :  { %1641 = vmatpush1.bf16.msra.mxu0 %v3756_v57  ;;  %1723 = vmatpush1.bf16.msra.mxu1 %v3759_v58  ;;  %v4721_v57 = vsub.s32 2, %v805_v54  ;;  %v4723_v58 = vsub.s32 1, %v805_v54 }
  0xd2   :  { %1642 = vmatprep.subr.bf16.mxu0 %v3764_v59  ;;  %1724 = vmatprep.subr.bf16.mxu1 %v3767_v60  ;;  %v4725_v59 = vsub.s32 3, %v805_v54  ;;  %v807_v60 = vrot.slane %v802_v55, %v4719_v56  ;;  %v3879_v54 = vld [vmem:[%s5435_s5 + $0x2e8] ss:$16 sps:$4 sm:$0xff]  }
  0xd3   :  { %v811_v36 = vrot.slane %v802_v55, %v4723_v58 }
  0xd5   :  { %1643 = vmatpush1.bf16.msra.mxu0 %v3762_v61  ;;  %1725 = vmatpush1.bf16.msra.mxu1 %v3765_v62  ;;  %v815_v61 = vrot.slane %v802_v55, %v4721_v57 }
  0xd6   :  { %1644 = vmatprep.subr.bf16.mxu0 %v3770_v63  ;;  %1726 = vmatprep.subr.bf16.mxu1 %v3773_v0  ;;  %v819_v0 = vrot.slane %v802_v55, %v4725_v59  ;;  %v3884_v55 = vld [vmem:[%s5435_s5 + $0x304] ss:$16 sps:$4 sm:$0xff]  }
  0xd9   :  { %1645 = vmatpush1.bf16.msra.mxu0 %v3768_v1  ;;  %1727 = vmatpush1.bf16.msra.mxu1 %v3771_v2 }
  0xda   :  { %1646 = vmatprep.subr.bf16.mxu0 %v3776_v3  ;;  %1728 = vmatprep.subr.bf16.mxu1 %v3779_v4 }
  0xdd   :  { %1647 = vmatpush1.bf16.msra.mxu0 %v3774_v5  ;;  %1729 = vmatpush1.bf16.msra.mxu1 %v3777_v6 }
  0xde   :  { %1648 = vmatprep.subr.bf16.mxu0 %v3782_v7  ;;  %1730 = vmatprep.subr.bf16.mxu1 %v3785_v8 }
  0xe1   :  { %1649 = vmatpush1.bf16.msra.mxu0 %v3780_v9  ;;  %1731 = vmatpush1.bf16.msra.mxu1 %v3783_v10 }
  0xe2   :  { %1650 = vmatprep.subr.bf16.mxu0 %v3788_v11  ;;  %1732 = vmatprep.subr.bf16.mxu1 %v3791_v12 }
  0xe5   :  { %1651 = vmatpush1.bf16.msra.mxu0 %v3786_v13  ;;  %1733 = vmatpush1.bf16.msra.mxu1 %v3789_v14 }
  0xe6   :  { %1652 = vmatprep.subr.bf16.mxu0 %v3794_v15  ;;  %1734 = vmatprep.subr.bf16.mxu1 %v3797_v16 }
  0xe9   :  { %1653 = vmatpush1.bf16.msra.mxu0 %v3792_v17  ;;  %1735 = vmatpush1.bf16.msra.mxu1 %v3795_v18 }
  0xea   :  { %1654 = vmatprep.subr.bf16.mxu0 %v3800_v19  ;;  %1736 = vmatprep.subr.bf16.mxu1 %v3803_v20  ;;  %v3834_v19 = vld [vmem:[%s5435_s5 + $0x200] ss:$16 sps:$4 sm:$0xff]   ;;  %v3837_v20 = vld [vmem:[%s5435_s5 + $0x208] ss:$16 sps:$4 sm:$0xff]  }
  0xed   :  { %1655 = vmatpush1.bf16.msra.mxu0 %v3798_v21  ;;  %1737 = vmatpush1.bf16.msra.mxu1 %v3801_v22 }
  0xee   :  { %1656 = vmatprep.subr.bf16.mxu0 %v3806_v23  ;;  %1738 = vmatprep.subr.bf16.mxu1 %v3809_v24  ;;  %v3842_v24 = vld [vmem:[%s5435_s5 + $0x224] ss:$16 sps:$4 sm:$0xff]  }
  0xf1   :  { %1657 = vmatpush1.bf16.msra.mxu0 %v3804_v25  ;;  %1739 = vmatpush1.bf16.msra.mxu1 %v3807_v26  ;;  %v3845_v25 = vld [vmem:[%s5435_s5 + $0x22c] ss:$16 sps:$4 sm:$0xff]  }
  0xf2   :  { %1658 = vmatprep.subr.bf16.mxu0 %v3812_v27  ;;  %1740 = vmatprep.subr.bf16.mxu1 %v3815_v28  ;;  %v3840_v28 = vld [vmem:[%s5435_s5 + $0x220] ss:$16 sps:$4 sm:$0xff]  }
  0xf5   :  { %1659 = vmatpush1.bf16.msra.mxu0 %v3810_v29  ;;  %1741 = vmatpush1.bf16.msra.mxu1 %v3813_v30  ;;  %v3843_v29 = vld [vmem:[%s5435_s5 + $0x228] ss:$16 sps:$4 sm:$0xff]   ;;  %v3848_v30 = vld [vmem:[%s5435_s5 + $0x244] ss:$16 sps:$4 sm:$0xff]  }
  0xf6   :  { %1660 = vmatprep.subr.bf16.mxu0 %v3818_v31  ;;  %1742 = vmatprep.subr.bf16.mxu1 %v3821_v32  ;;  %v3851_v31 = vld [vmem:[%s5435_s5 + $0x24c] ss:$16 sps:$4 sm:$0xff]   ;;  %v3846_v32 = vld [vmem:[%s5435_s5 + $0x240] ss:$16 sps:$4 sm:$0xff]  }
  0xf9   :  { %1661 = vmatpush1.bf16.msra.mxu0 %v3816_v33  ;;  %1743 = vmatpush1.bf16.msra.mxu1 %v3819_v34  ;;  %v3849_v33 = vld [vmem:[%s5435_s5 + $0x248] ss:$16 sps:$4 sm:$0xff]   ;;  %v3854_v34 = vld [vmem:[%s5435_s5 + $0x264] ss:$16 sps:$4 sm:$0xff]  }
  0xfa   :  { %1662 = vmatprep.subr.bf16.mxu0 %v3824_v35  ;;  %1744 = vmatprep.subr.bf16.mxu1 %v3827_v38  ;;  %v3857_v35 = vld [vmem:[%s5435_s5 + $0x26c] ss:$16 sps:$4 sm:$0xff]   ;;  %v3852_v38 = vld [vmem:[%s5435_s5 + $0x260] ss:$16 sps:$4 sm:$0xff]  }
  0xfd   :  { %1663 = vmatpush1.bf16.msra.mxu0 %v3822_v39  ;;  %1745 = vmatpush1.bf16.msra.mxu1 %v3825_v40  ;;  %v3855_v39 = vld [vmem:[%s5435_s5 + $0x268] ss:$16 sps:$4 sm:$0xff]   ;;  %v3860_v40 = vld [vmem:[%s5435_s5 + $0x284] ss:$16 sps:$4 sm:$0xff]  }
  0xfe   :  { %1664 = vmatprep.subr.bf16.mxu0 %v3830_v41  ;;  %1746 = vmatprep.subr.bf16.mxu1 %v3833_v42  ;;  %v3863_v41 = vld [vmem:[%s5435_s5 + $0x28c] ss:$16 sps:$4 sm:$0xff]   ;;  %v3858_v42 = vld [vmem:[%s5435_s5 + $0x280] ss:$16 sps:$4 sm:$0xff]  }
 0x101   :  { %1665 = vmatpush1.bf16.msra.mxu0 %v3828_v43  ;;  %1747 = vmatpush1.bf16.msra.mxu1 %v3831_v44  ;;  %v3861_v43 = vld [vmem:[%s5435_s5 + $0x288] ss:$16 sps:$4 sm:$0xff]   ;;  %v3866_v44 = vld [vmem:[%s5435_s5 + $0x2a4] ss:$16 sps:$4 sm:$0xff]  }
 0x102   :  { %1675 = vmatprep.subr.bf16.mxu0 %v3836_v45  ;;  %1757 = vmatprep.subr.bf16.mxu1 %v3839_v46  ;;  %v3869_v45 = vld [vmem:[%s5435_s5 + $0x2ac] ss:$16 sps:$4 sm:$0xff]   ;;  %v3864_v46 = vld [vmem:[%s5435_s5 + $0x2a0] ss:$16 sps:$4 sm:$0xff]  }
 0x157   :  { %v352_v37 = vpop.f32.mrb[0].mxu0  ;;  %v393_v47 = vpop.f32.mrb[0].mxu1 }
 0x158   :  { %v354_v48 = vpop.f32.mrb[1].mxu0  ;;  %v395_v49 = vpop.f32.mrb[1].mxu1 }
 0x159   :  { %v356_v50 = vpop.f32.mrb[2].mxu0  ;;  %v397_v51 = vpop.f32.mrb[2].mxu1 }
 0x15a   :  { %v357_v52 = vpop.f32.mrb[3].mxu0  ;;  %v398_v53 = vpop.f32.mrb[3].mxu1  ;;  %v3873_v50 = vld [vmem:[%s5435_s5 + $0x2c8] ss:$16 sps:$4 sm:$0xff]   ;;  %v3878_v51 = vld [vmem:[%s5435_s5 + $0x2e4] ss:$16 sps:$4 sm:$0xff]  }
 0x15b   :  { %v3881_v52 = vld [vmem:[%s5435_s5 + $0x2ec] ss:$16 sps:$4 sm:$0xff]   ;;  %v3876_v53 = vld [vmem:[%s5435_s5 + $0x2e0] ss:$16 sps:$4 sm:$0xff]  }
 0x197   :  { %v754_v62 = vpop.f32.mrb[4].mxu0  ;;  %v795_v63 = vpop.f32.mrb[4].mxu1 }
 0x198   :  { %v755_v1 = vadd.f32 %v754_v62, %v352_v37  ;;  %v796_v2 = vadd.f32 %v795_v63, %v393_v47  ;;  %v756_v3 = vpop.f32.mrb[5].mxu0  ;;  %v797_v4 = vpop.f32.mrb[5].mxu1  ;;  %v3867_v37 = vld [vmem:[%s5435_s5 + $0x2a8] ss:$16 sps:$4 sm:$0xff]   ;;  %v3872_v47 = vld [vmem:[%s5435_s5 + $0x2c4] ss:$16 sps:$4 sm:$0xff]  }
 0x199   :  { %v757_v5 = vadd.f32 %v756_v3, %v354_v48  ;;  %v798_v6 = vadd.f32 %v797_v4, %v395_v49  ;;  %v758_v7 = vpop.f32.mrb[6].mxu0  ;;  %v799_v8 = vpop.f32.mrb[6].mxu1  ;;  %v3875_v48 = vld [vmem:[%s5435_s5 + $0x2cc] ss:$16 sps:$4 sm:$0xff]   ;;  %v3870_v49 = vld [vmem:[%s5435_s5 + $0x2c0] ss:$16 sps:$4 sm:$0xff]  }
 0x19a   :  { %v824_v9 = vadd.f32 %v807_v60, %v755_v1  ;;  %v4731_v10 = vadd.f32 %v815_v61, %v796_v2  ;;  %v759_v11 = vpop.f32.mrb[7].mxu0  ;;  %v800_v12 = vpop.f32.mrb[7].mxu1  ;;  %v3887_v60 = vld [vmem:[%s5435_s5 + $0x30c] ss:$16 sps:$4 sm:$0xff]   ;;  %v3882_v61 = vld [vmem:[%s5435_s5 + $0x300] ss:$16 sps:$4 sm:$0xff]  }
 0x19b   :  { %v825_v13 = vadd.f32 %v811_v36, %v757_v5  ;;  %v827_v14 = vadd.f32 %v819_v0, %v798_v6  ;;  %v3885_v62 = vld [vmem:[%s5435_s5 + $0x308] ss:$16 sps:$4 sm:$0xff]   ;;  %v3890_v63 = vld [vmem:[%s5435_s5 + $0x324] ss:$16 sps:$4 sm:$0xff]   ;;  %v3893_v36 = vld [vmem:[%s5435_s5 + $0x32c] ss:$16 sps:$4 sm:$0xff]  }
 0x19c   :  { %vm828_vm2 = vcmp.gt.f32.partialorder %v824_v9, 0.0  ;;  %v832_v15 = vmul.f32 0.2, %v824_v9  ;;  %v3888_v0 = vld [vmem:[%s5435_s5 + $0x320] ss:$16 sps:$4 sm:$0xff]   ;;  %vm830_vm5 = vcmp.gt.f32.partialorder %v4731_v10, 0.0 }
 0x19d   :  { %v833_v16 = vmul.f32 0.2, %v825_v13  ;;  %v835_v17 = vmul.f32 0.2, %v827_v14  ;;  %vm829_vm3 = vcmp.gt.f32.partialorder %v825_v13, 0.0  ;;  %vm831_vm4 = vcmp.gt.f32.partialorder %v827_v14, 0.0 }
 0x19e   :  { %v836_v18 = vsel %vm828_vm2, %v824_v9, %v832_v15  ;;  %v3891_v1 = vld [vmem:[%s5435_s5 + $0x328] ss:$16 sps:$4 sm:$0xff]   ;;  %v3896_v2 = vld [vmem:[%s5435_s5 + $0x344] ss:$16 sps:$4 sm:$0xff]   ;;  %v3899_v3 = vld [vmem:[%s5435_s5 + $0x34c] ss:$16 sps:$4 sm:$0xff]  }
 0x19f   :  { %v837_v21 = vsel %vm829_vm3, %v825_v13, %v833_v16  ;;  %v839_v23 = vsel %vm831_vm4, %v827_v14, %v835_v17  ;;  %v840_v26 = vpack.c.bf16 %v836_v18, %v836_v18  ;;  %v3894_v4 = vld [vmem:[%s5435_s5 + $0x340] ss:$16 sps:$4 sm:$0xff]   ;;  %v3897_v5 = vld [vmem:[%s5435_s5 + $0x348] ss:$16 sps:$4 sm:$0xff]   ;;  %v3902_v6 = vld [vmem:[%s5435_s5 + $0x364] ss:$16 sps:$4 sm:$0xff]  }
 0x1a0   :  { %v841_v22 = vpack.c.bf16 %v837_v21, %v837_v21  ;;  %v843_v27 = vpack.c.bf16 %v839_v23, %v839_v23  ;;  %v3905_v7 = vld [vmem:[%s5435_s5 + $0x36c] ss:$16 sps:$4 sm:$0xff]   ;;  %v3900_v8 = vld [vmem:[%s5435_s5 + $0x360] ss:$16 sps:$4 sm:$0xff]   ;;  %v3903_v9 = vld [vmem:[%s5435_s5 + $0x368] ss:$16 sps:$4 sm:$0xff]  }
 0x1a1   :  { %v3908_v11 = vld [vmem:[%s5435_s5 + $0x384] ss:$16 sps:$4 sm:$0xff]   ;;  %v3911_v12 = vld [vmem:[%s5435_s5 + $0x38c] ss:$16 sps:$4 sm:$0xff]   ;;  %v3906_v13 = vld [vmem:[%s5435_s5 + $0x380] ss:$16 sps:$4 sm:$0xff]  }
 0x1a2   :  { %1666 = vmatprep.mubr.bf16.mxu0 %v841_v22  ;;  %1748 = vmatprep.mubr.bf16.mxu1 %v841_v22  ;;  %v3909_v14 = vld [vmem:[%s5435_s5 + $0x388] ss:$16 sps:$4 sm:$0xff]   ;;  %v3914_v15 = vld [vmem:[%s5435_s5 + $0x3a4] ss:$16 sps:$4 sm:$0xff]   ;;  %v3917_v16 = vld [vmem:[%s5435_s5 + $0x3ac] ss:$16 sps:$4 sm:$0xff]  }
 0x1a3   :  { %1667 = vmatmul.mubr.bf16.vlgmr.msra.gmra.mrb[8].mxu0 %v840_v26  ;;  %1749 = vmatmul.mubr.bf16.vlgmr.msra.gmra.mrb[8].mxu1 %v840_v26  ;;  %v3912_v17 = vld [vmem:[%s5435_s5 + $0x3a0] ss:$16 sps:$4 sm:$0xff]   ;;  %v3915_v18 = vld [vmem:[%s5435_s5 + $0x3a8] ss:$16 sps:$4 sm:$0xff]   ;;  %v3926_v23 = vld [vmem:[%s5435_s5 + $0x3e4] ss:$16 sps:$4 sm:$0xff]  }
 0x1a4   :  { %1676 = vmatpush1.bf16.msra.mxu0 %v3834_v19  ;;  %1758 = vmatpush1.bf16.msra.mxu1 %v3837_v20  ;;  %v3920_v19 = vld [vmem:[%s5435_s5 + $0x3c4] ss:$16 sps:$4 sm:$0xff]   ;;  %v3923_v20 = vld [vmem:[%s5435_s5 + $0x3cc] ss:$16 sps:$4 sm:$0xff]   ;;  %v3918_v21 = vld [vmem:[%s5435_s5 + $0x3c0] ss:$16 sps:$4 sm:$0xff]  }
 0x1a5   :  { %1707 = vmatprep.mubr.bf16.mxu0 %v843_v27  ;;  %1789 = vmatprep.mubr.bf16.mxu1 %v843_v27  ;;  %v3921_v22 = vld [vmem:[%s5435_s5 + $0x3c8] ss:$16 sps:$4 sm:$0xff]   ;;  %v3924_v26 = vld [vmem:[%s5435_s5 + $0x3e0] ss:$16 sps:$4 sm:$0xff]  }
 0x1a6   :  { %1677 = vmatprep.subr.bf16.mxu0 %v3842_v24  ;;  %1759 = vmatprep.subr.bf16.mxu1 %v3845_v25  ;;  %v3929_v24 = vld [vmem:[%s5435_s5 + $0x3ec] ss:$16 sps:$4 sm:$0xff]   ;;  %v834_v25 = vmul.f32 0.2, %v4731_v10  ;;  %v3927_v27 = vld [vmem:[%s5435_s5 + $0x3e8] ss:$16 sps:$4 sm:$0xff]  }
 0x1a8   :  { %1678 = vmatpush1.bf16.msra.mxu0 %v3840_v28  ;;  %1760 = vmatpush1.bf16.msra.mxu1 %v3843_v29  ;;  %v3932_v28 = vld [vmem:[%s5436_s7 + $0x4] ss:$16 sps:$4 sm:$0xff]   ;;  %v3935_v29 = vld [vmem:[%s5436_s7 + $0xc] ss:$16 sps:$4 sm:$0xff]  }
 0x1a9   :  { %1679 = vmatprep.subr.bf16.mxu0 %v3848_v30  ;;  %1761 = vmatprep.subr.bf16.mxu1 %v3851_v31  ;;  %v838_v30 = vsel %vm830_vm5, %v4731_v10, %v834_v25  ;;  %v3930_v31 = vld [vmem:[%s5436_s7] ss:$16 sps:$4 sm:$0xff]   ;;  %v3941_v10 = vld [vmem:[%s5436_s7 + $0x2c] ss:$16 sps:$4 sm:$0xff]   ;;  %v4011_v25 = vld [vmem:[%s5436_s7 + $0x1a8] ss:$16 sps:$4 sm:$0xff]  }
 0x1ac   :  { %1680 = vmatpush1.bf16.msra.mxu0 %v3846_v32  ;;  %1762 = vmatpush1.bf16.msra.mxu1 %v3849_v33  ;;  %v3933_v32 = vld [vmem:[%s5436_s7 + $0x8] ss:$16 sps:$4 sm:$0xff]   ;;  %v842_v33 = vpack.c.bf16 %v838_v30, %v838_v30  ;;  %v4022_v30 = vld [vmem:[%s5436_s7 + $0x1e4] ss:$16 sps:$4 sm:$0xff]  }
 0x1ad   :  { %1681 = vmatprep.subr.bf16.mxu0 %v3854_v34  ;;  %1763 = vmatprep.subr.bf16.mxu1 %v3857_v35  ;;  %v3938_v34 = vld [vmem:[%s5436_s7 + $0x24] ss:$16 sps:$4 sm:$0xff]   ;;  %v3936_v35 = vld [vmem:[%s5436_s7 + $0x20] ss:$16 sps:$4 sm:$0xff]  }
 0x1b0   :  { %1682 = vmatpush1.bf16.msra.mxu0 %v3852_v38  ;;  %1764 = vmatpush1.bf16.msra.mxu1 %v3855_v39  ;;  %v3939_v38 = vld [vmem:[%s5436_s7 + $0x28] ss:$16 sps:$4 sm:$0xff]   ;;  %v3944_v39 = vld [vmem:[%s5436_s7 + $0x44] ss:$16 sps:$4 sm:$0xff]  }
 0x1b1   :  { %1683 = vmatprep.subr.bf16.mxu0 %v3860_v40  ;;  %1765 = vmatprep.subr.bf16.mxu1 %v3863_v41  ;;  %v3947_v40 = vld [vmem:[%s5436_s7 + $0x4c] ss:$16 sps:$4 sm:$0xff]   ;;  %v3942_v41 = vld [vmem:[%s5436_s7 + $0x40] ss:$16 sps:$4 sm:$0xff]  }
 0x1b4   :  { %1684 = vmatpush1.bf16.msra.mxu0 %v3858_v42  ;;  %1766 = vmatpush1.bf16.msra.mxu1 %v3861_v43  ;;  %v3945_v42 = vld [vmem:[%s5436_s7 + $0x48] ss:$16 sps:$4 sm:$0xff]   ;;  %v3950_v43 = vld [vmem:[%s5436_s7 + $0x64] ss:$16 sps:$4 sm:$0xff]  }
 0x1b5   :  { %1685 = vmatprep.subr.bf16.mxu0 %v3866_v44  ;;  %1767 = vmatprep.subr.bf16.mxu1 %v3869_v45  ;;  %v3953_v44 = vld [vmem:[%s5436_s7 + $0x6c] ss:$16 sps:$4 sm:$0xff]   ;;  %v3948_v45 = vld [vmem:[%s5436_s7 + $0x60] ss:$16 sps:$4 sm:$0xff]  }
 0x1b8   :  { %1686 = vmatpush1.bf16.msra.mxu0 %v3864_v46  ;;  %1768 = vmatpush1.bf16.msra.mxu1 %v3867_v37  ;;  %v3951_v46 = vld [vmem:[%s5436_s7 + $0x68] ss:$16 sps:$4 sm:$0xff]   ;;  %v3956_v37 = vld [vmem:[%s5436_s7 + $0x84] ss:$16 sps:$4 sm:$0xff]  }
 0x1b9   :  { %1687 = vmatprep.subr.bf16.mxu0 %v3872_v47  ;;  %1769 = vmatprep.subr.bf16.mxu1 %v3875_v48  ;;  %v3959_v47 = vld [vmem:[%s5436_s7 + $0x8c] ss:$16 sps:$4 sm:$0xff]   ;;  %v3954_v48 = vld [vmem:[%s5436_s7 + $0x80] ss:$16 sps:$4 sm:$0xff]  }
 0x1bc   :  { %1688 = vmatpush1.bf16.msra.mxu0 %v3870_v49  ;;  %1770 = vmatpush1.bf16.msra.mxu1 %v3873_v50  ;;  %v3957_v49 = vld [vmem:[%s5436_s7 + $0x88] ss:$16 sps:$4 sm:$0xff]   ;;  %v3962_v50 = vld [vmem:[%s5436_s7 + $0xa4] ss:$16 sps:$4 sm:$0xff]  }
 0x1bd   :  { %1689 = vmatprep.subr.bf16.mxu0 %v3878_v51  ;;  %1771 = vmatprep.subr.bf16.mxu1 %v3881_v52  ;;  %v3965_v51 = vld [vmem:[%s5436_s7 + $0xac] ss:$16 sps:$4 sm:$0xff]   ;;  %v3960_v52 = vld [vmem:[%s5436_s7 + $0xa0] ss:$16 sps:$4 sm:$0xff]  }
 0x1c0   :  { %1690 = vmatpush1.bf16.msra.mxu0 %v3876_v53  ;;  %1772 = vmatpush1.bf16.msra.mxu1 %v3879_v54  ;;  %v3963_v53 = vld [vmem:[%s5436_s7 + $0xa8] ss:$16 sps:$4 sm:$0xff]   ;;  %v3968_v54 = vld [vmem:[%s5436_s7 + $0xc4] ss:$16 sps:$4 sm:$0xff]  }
 0x1c1   :  { %1691 = vmatprep.subr.bf16.mxu0 %v3884_v55  ;;  %1773 = vmatprep.subr.bf16.mxu1 %v3887_v60  ;;  %v3971_v55 = vld [vmem:[%s5436_s7 + $0xcc] ss:$16 sps:$4 sm:$0xff]   ;;  %v3966_v60 = vld [vmem:[%s5436_s7 + $0xc0] ss:$16 sps:$4 sm:$0xff]  }
 0x1c4   :  { %1692 = vmatpush1.bf16.msra.mxu0 %v3882_v61  ;;  %1774 = vmatpush1.bf16.msra.mxu1 %v3885_v62  ;;  %v3969_v61 = vld [vmem:[%s5436_s7 + $0xc8] ss:$16 sps:$4 sm:$0xff]   ;;  %v3974_v62 = vld [vmem:[%s5436_s7 + $0xe4] ss:$16 sps:$4 sm:$0xff]  }
 0x1c5   :  { %1693 = vmatprep.subr.bf16.mxu0 %v3890_v63  ;;  %1775 = vmatprep.subr.bf16.mxu1 %v3893_v36  ;;  %v3977_v63 = vld [vmem:[%s5436_s7 + $0xec] ss:$16 sps:$4 sm:$0xff]   ;;  %v3972_v36 = vld [vmem:[%s5436_s7 + $0xe0] ss:$16 sps:$4 sm:$0xff]  }
 0x1c8   :  { %1694 = vmatpush1.bf16.msra.mxu0 %v3888_v0  ;;  %1776 = vmatpush1.bf16.msra.mxu1 %v3891_v1  ;;  %v3975_v0 = vld [vmem:[%s5436_s7 + $0xe8] ss:$16 sps:$4 sm:$0xff]   ;;  %v3980_v1 = vld [vmem:[%s5436_s7 + $0x104] ss:$16 sps:$4 sm:$0xff]  }
 0x1c9   :  { %1695 = vmatprep.subr.bf16.mxu0 %v3896_v2  ;;  %1777 = vmatprep.subr.bf16.mxu1 %v3899_v3  ;;  %v3983_v2 = vld [vmem:[%s5436_s7 + $0x10c] ss:$16 sps:$4 sm:$0xff]   ;;  %v3978_v3 = vld [vmem:[%s5436_s7 + $0x100] ss:$16 sps:$4 sm:$0xff]  }
 0x1cc   :  { %1696 = vmatpush1.bf16.msra.mxu0 %v3894_v4  ;;  %1778 = vmatpush1.bf16.msra.mxu1 %v3897_v5  ;;  %v3981_v4 = vld [vmem:[%s5436_s7 + $0x108] ss:$16 sps:$4 sm:$0xff]   ;;  %v3986_v5 = vld [vmem:[%s5436_s7 + $0x124] ss:$16 sps:$4 sm:$0xff]  }
 0x1cd   :  { %1697 = vmatprep.subr.bf16.mxu0 %v3902_v6  ;;  %1779 = vmatprep.subr.bf16.mxu1 %v3905_v7  ;;  %v3989_v6 = vld [vmem:[%s5436_s7 + $0x12c] ss:$16 sps:$4 sm:$0xff]   ;;  %v3984_v7 = vld [vmem:[%s5436_s7 + $0x120] ss:$16 sps:$4 sm:$0xff]  }
 0x1d0   :  { %1698 = vmatpush1.bf16.msra.mxu0 %v3900_v8  ;;  %1780 = vmatpush1.bf16.msra.mxu1 %v3903_v9  ;;  %v3987_v8 = vld [vmem:[%s5436_s7 + $0x128] ss:$16 sps:$4 sm:$0xff]   ;;  %v3992_v9 = vld [vmem:[%s5436_s7 + $0x144] ss:$16 sps:$4 sm:$0xff]  }
 0x1d1   :  { %1699 = vmatprep.subr.bf16.mxu0 %v3908_v11  ;;  %1781 = vmatprep.subr.bf16.mxu1 %v3911_v12  ;;  %v3995_v11 = vld [vmem:[%s5436_s7 + $0x14c] ss:$16 sps:$4 sm:$0xff]   ;;  %v3990_v12 = vld [vmem:[%s5436_s7 + $0x140] ss:$16 sps:$4 sm:$0xff]  }
 0x1d4   :  { %1700 = vmatpush1.bf16.msra.mxu0 %v3906_v13  ;;  %1782 = vmatpush1.bf16.msra.mxu1 %v3909_v14  ;;  %v3993_v13 = vld [vmem:[%s5436_s7 + $0x148] ss:$16 sps:$4 sm:$0xff]   ;;  %v3998_v14 = vld [vmem:[%s5436_s7 + $0x164] ss:$16 sps:$4 sm:$0xff]  }
 0x1d5   :  { %1701 = vmatprep.subr.bf16.mxu0 %v3914_v15  ;;  %1783 = vmatprep.subr.bf16.mxu1 %v3917_v16  ;;  %v4001_v15 = vld [vmem:[%s5436_s7 + $0x16c] ss:$16 sps:$4 sm:$0xff]   ;;  %v3996_v16 = vld [vmem:[%s5436_s7 + $0x160] ss:$16 sps:$4 sm:$0xff]  }
 0x1d8   :  { %1702 = vmatpush1.bf16.msra.mxu0 %v3912_v17  ;;  %1784 = vmatpush1.bf16.msra.mxu1 %v3915_v18  ;;  %v3999_v17 = vld [vmem:[%s5436_s7 + $0x168] ss:$16 sps:$4 sm:$0xff]   ;;  %v4004_v18 = vld [vmem:[%s5436_s7 + $0x184] ss:$16 sps:$4 sm:$0xff]  }
 0x1d9   :  { %1703 = vmatprep.subr.bf16.mxu0 %v3920_v19  ;;  %1785 = vmatprep.subr.bf16.mxu1 %v3923_v20  ;;  %v4007_v19 = vld [vmem:[%s5436_s7 + $0x18c] ss:$16 sps:$4 sm:$0xff]   ;;  %v4002_v20 = vld [vmem:[%s5436_s7 + $0x180] ss:$16 sps:$4 sm:$0xff]  }
 0x1dc   :  { %1704 = vmatpush1.bf16.msra.mxu0 %v3918_v21  ;;  %1786 = vmatpush1.bf16.msra.mxu1 %v3921_v22  ;;  %v4005_v21 = vld [vmem:[%s5436_s7 + $0x188] ss:$16 sps:$4 sm:$0xff]   ;;  %v4010_v22 = vld [vmem:[%s5436_s7 + $0x1a4] ss:$16 sps:$4 sm:$0xff]  }
 0x1dd   :  { %1705 = vmatprep.subr.bf16.mxu0 %v3926_v23  ;;  %1787 = vmatprep.subr.bf16.mxu1 %v3929_v24  ;;  %v4013_v23 = vld [vmem:[%s5436_s7 + $0x1ac] ss:$16 sps:$4 sm:$0xff]   ;;  %v4008_v24 = vld [vmem:[%s5436_s7 + $0x1a0] ss:$16 sps:$4 sm:$0xff]  }
 0x1e0   :  { %1706 = vmatpush1.bf16.msra.mxu0 %v3924_v26  ;;  %1788 = vmatpush1.bf16.msra.mxu1 %v3927_v27  ;;  %v4016_v26 = vld [vmem:[%s5436_s7 + $0x1c4] ss:$16 sps:$4 sm:$0xff]   ;;  %v4019_v27 = vld [vmem:[%s5436_s7 + $0x1cc] ss:$16 sps:$4 sm:$0xff]  }
 0x1e1   :  { %2604 = vmatprep.subr.bf16.mxu0 %v3932_v28  ;;  %2686 = vmatprep.subr.bf16.mxu1 %v3935_v29  ;;  %v4014_v28 = vld [vmem:[%s5436_s7 + $0x1c0] ss:$16 sps:$4 sm:$0xff]   ;;  %v4017_v29 = vld [vmem:[%s5436_s7 + $0x1c8] ss:$16 sps:$4 sm:$0xff]  }
 0x1e3   :  { %1708 = vmatmul.mubr.bf16.vlgmr.msra.gmra.mrb[8].mxu0 %v842_v33  ;;  %1790 = vmatmul.mubr.bf16.vlgmr.msra.gmra.mrb[8].mxu1 %v842_v33  ;;  %v4023_v33 = vld [vmem:[%s5436_s7 + $0x1e8] ss:$16 sps:$4 sm:$0xff]  }
 0x1e4   :  { %2605 = vmatpush1.bf16.msra.mxu0 %v3930_v31  ;;  %2687 = vmatpush1.bf16.msra.mxu1 %v3933_v32  ;;  %v4025_v31 = vld [vmem:[%s5436_s7 + $0x1ec] ss:$16 sps:$4 sm:$0xff]   ;;  %v4020_v32 = vld [vmem:[%s5436_s7 + $0x1e0] ss:$16 sps:$4 sm:$0xff]  }
 0x1e5   :  { %2606 = vmatprep.subr.bf16.mxu0 %v3938_v34  ;;  %2688 = vmatprep.subr.bf16.mxu1 %v3941_v10  ;;  %v4028_v34 = vld [vmem:[%s5436_s7 + $0x204] ss:$16 sps:$4 sm:$0xff]   ;;  %v4031_v10 = vld [vmem:[%s5436_s7 + $0x20c] ss:$16 sps:$4 sm:$0xff]  }
 0x1e8   :  { %2607 = vmatpush1.bf16.msra.mxu0 %v3936_v35  ;;  %2689 = vmatpush1.bf16.msra.mxu1 %v3939_v38  ;;  %v5123_v35 = vld [vmem:[%s5439_s6] sm:$0xf] }
 0x1e9   :  { %2608 = vmatprep.subr.bf16.mxu0 %v3944_v39  ;;  %2690 = vmatprep.subr.bf16.mxu1 %v3947_v40  ;;  %v977_v38 = vrot.slane %v5123_v35, %v4719_v56  ;;  %v981_v39 = vrot.slane %v5123_v35, %v4723_v58  ;;  %v989_v40 = vrot.slane %v5123_v35, %v4725_v59 }
 0x1ec   :  { %2609 = vmatpush1.bf16.msra.mxu0 %v3942_v41  ;;  %2691 = vmatpush1.bf16.msra.mxu1 %v3945_v42 }
 0x1ed   :  { %2610 = vmatprep.subr.bf16.mxu0 %v3950_v43  ;;  %2692 = vmatprep.subr.bf16.mxu1 %v3953_v44 }
 0x1f0   :  { %2611 = vmatpush1.bf16.msra.mxu0 %v3948_v45  ;;  %2693 = vmatpush1.bf16.msra.mxu1 %v3951_v46 }
 0x1f1   :  { %2612 = vmatprep.subr.bf16.mxu0 %v3956_v37  ;;  %2694 = vmatprep.subr.bf16.mxu1 %v3959_v47 }
 0x1f4   :  { %2613 = vmatpush1.bf16.msra.mxu0 %v3954_v48  ;;  %2695 = vmatpush1.bf16.msra.mxu1 %v3957_v49 }
 0x1f5   :  { %2614 = vmatprep.subr.bf16.mxu0 %v3962_v50  ;;  %2696 = vmatprep.subr.bf16.mxu1 %v3965_v51 }
 0x1f8   :  { %2615 = vmatpush1.bf16.msra.mxu0 %v3960_v52  ;;  %2697 = vmatpush1.bf16.msra.mxu1 %v3963_v53 }
 0x1f9   :  { %2616 = vmatprep.subr.bf16.mxu0 %v3968_v54  ;;  %2698 = vmatprep.subr.bf16.mxu1 %v3971_v55 }
 0x1fc   :  { %2617 = vmatpush1.bf16.msra.mxu0 %v3966_v60  ;;  %2699 = vmatpush1.bf16.msra.mxu1 %v3969_v61  ;;  %v4026_v61 = vld [vmem:[%s5436_s7 + $0x200] ss:$16 sps:$4 sm:$0xff]  }
 0x1fd   :  { %2618 = vmatprep.subr.bf16.mxu0 %v3974_v62  ;;  %2700 = vmatprep.subr.bf16.mxu1 %v3977_v63  ;;  %v4029_v62 = vld [vmem:[%s5436_s7 + $0x208] ss:$16 sps:$4 sm:$0xff]  }
 0x200   :  { %2619 = vmatpush1.bf16.msra.mxu0 %v3972_v36  ;;  %2701 = vmatpush1.bf16.msra.mxu1 %v3975_v0  ;;  %v4034_v0 = vld [vmem:[%s5436_s7 + $0x224] ss:$16 sps:$4 sm:$0xff]  }
 0x201   :  { %2620 = vmatprep.subr.bf16.mxu0 %v3980_v1  ;;  %2702 = vmatprep.subr.bf16.mxu1 %v3983_v2  ;;  %v4037_v1 = vld [vmem:[%s5436_s7 + $0x22c] ss:$16 sps:$4 sm:$0xff]  }
 0x204   :  { %2621 = vmatpush1.bf16.msra.mxu0 %v3978_v3  ;;  %2703 = vmatpush1.bf16.msra.mxu1 %v3981_v4  ;;  %v4032_v3 = vld [vmem:[%s5436_s7 + $0x220] ss:$16 sps:$4 sm:$0xff]   ;;  %v4035_v4 = vld [vmem:[%s5436_s7 + $0x228] ss:$16 sps:$4 sm:$0xff]  }
 0x205   :  { %2622 = vmatprep.subr.bf16.mxu0 %v3986_v5  ;;  %2704 = vmatprep.subr.bf16.mxu1 %v3989_v6  ;;  %v4040_v5 = vld [vmem:[%s5436_s7 + $0x244] ss:$16 sps:$4 sm:$0xff]   ;;  %v4043_v6 = vld [vmem:[%s5436_s7 + $0x24c] ss:$16 sps:$4 sm:$0xff]  }
 0x208   :  { %2623 = vmatpush1.bf16.msra.mxu0 %v3984_v7  ;;  %2705 = vmatpush1.bf16.msra.mxu1 %v3987_v8  ;;  %v4038_v7 = vld [vmem:[%s5436_s7 + $0x240] ss:$16 sps:$4 sm:$0xff]   ;;  %v4041_v8 = vld [vmem:[%s5436_s7 + $0x248] ss:$16 sps:$4 sm:$0xff]  }
 0x209   :  { %2624 = vmatprep.subr.bf16.mxu0 %v3992_v9  ;;  %2706 = vmatprep.subr.bf16.mxu1 %v3995_v11  ;;  %v4046_v9 = vld [vmem:[%s5436_s7 + $0x264] ss:$16 sps:$4 sm:$0xff]   ;;  %v4049_v11 = vld [vmem:[%s5436_s7 + $0x26c] ss:$16 sps:$4 sm:$0xff]  }
 0x20c   :  { %2625 = vmatpush1.bf16.msra.mxu0 %v3990_v12  ;;  %2707 = vmatpush1.bf16.msra.mxu1 %v3993_v13  ;;  %v4044_v12 = vld [vmem:[%s5436_s7 + $0x260] ss:$16 sps:$4 sm:$0xff]   ;;  %v4047_v13 = vld [vmem:[%s5436_s7 + $0x268] ss:$16 sps:$4 sm:$0xff]  }
 0x20d   :  { %2626 = vmatprep.subr.bf16.mxu0 %v3998_v14  ;;  %2708 = vmatprep.subr.bf16.mxu1 %v4001_v15  ;;  %v4052_v14 = vld [vmem:[%s5436_s7 + $0x284] ss:$16 sps:$4 sm:$0xff]   ;;  %v4055_v15 = vld [vmem:[%s5436_s7 + $0x28c] ss:$16 sps:$4 sm:$0xff]  }
 0x210   :  { %2627 = vmatpush1.bf16.msra.mxu0 %v3996_v16  ;;  %2709 = vmatpush1.bf16.msra.mxu1 %v3999_v17  ;;  %v4050_v16 = vld [vmem:[%s5436_s7 + $0x280] ss:$16 sps:$4 sm:$0xff]   ;;  %v4053_v17 = vld [vmem:[%s5436_s7 + $0x288] ss:$16 sps:$4 sm:$0xff]  }
 0x211   :  { %2628 = vmatprep.subr.bf16.mxu0 %v4004_v18  ;;  %2710 = vmatprep.subr.bf16.mxu1 %v4007_v19  ;;  %v4058_v18 = vld [vmem:[%s5436_s7 + $0x2a4] ss:$16 sps:$4 sm:$0xff]   ;;  %v4061_v19 = vld [vmem:[%s5436_s7 + $0x2ac] ss:$16 sps:$4 sm:$0xff]  }
 0x214   :  { %2629 = vmatpush1.bf16.msra.mxu0 %v4002_v20  ;;  %2711 = vmatpush1.bf16.msra.mxu1 %v4005_v21  ;;  %v4056_v20 = vld [vmem:[%s5436_s7 + $0x2a0] ss:$16 sps:$4 sm:$0xff]   ;;  %v4059_v21 = vld [vmem:[%s5436_s7 + $0x2a8] ss:$16 sps:$4 sm:$0xff]  }
 0x215   :  { %2630 = vmatprep.subr.bf16.mxu0 %v4010_v22  ;;  %2712 = vmatprep.subr.bf16.mxu1 %v4013_v23  ;;  %v4064_v22 = vld [vmem:[%s5436_s7 + $0x2c4] ss:$16 sps:$4 sm:$0xff]   ;;  %v4067_v23 = vld [vmem:[%s5436_s7 + $0x2cc] ss:$16 sps:$4 sm:$0xff]  }
 0x218   :  { %2631 = vmatpush1.bf16.msra.mxu0 %v4008_v24  ;;  %2713 = vmatpush1.bf16.msra.mxu1 %v4011_v25  ;;  %v4062_v24 = vld [vmem:[%s5436_s7 + $0x2c0] ss:$16 sps:$4 sm:$0xff]   ;;  %v4065_v25 = vld [vmem:[%s5436_s7 + $0x2c8] ss:$16 sps:$4 sm:$0xff]  }
 0x219   :  { %2632 = vmatprep.subr.bf16.mxu0 %v4016_v26  ;;  %2714 = vmatprep.subr.bf16.mxu1 %v4019_v27  ;;  %v4070_v26 = vld [vmem:[%s5436_s7 + $0x2e4] ss:$16 sps:$4 sm:$0xff]   ;;  %v4073_v27 = vld [vmem:[%s5436_s7 + $0x2ec] ss:$16 sps:$4 sm:$0xff]  }
 0x21c   :  { %2633 = vmatpush1.bf16.msra.mxu0 %v4014_v28  ;;  %2715 = vmatpush1.bf16.msra.mxu1 %v4017_v29  ;;  %v4068_v28 = vld [vmem:[%s5436_s7 + $0x2e0] ss:$16 sps:$4 sm:$0xff]   ;;  %v4071_v29 = vld [vmem:[%s5436_s7 + $0x2e8] ss:$16 sps:$4 sm:$0xff]  }
 0x21d   :  { %2634 = vmatprep.subr.bf16.mxu0 %v4022_v30  ;;  %2716 = vmatprep.subr.bf16.mxu1 %v4025_v31  ;;  %v4076_v30 = vld [vmem:[%s5436_s7 + $0x304] ss:$16 sps:$4 sm:$0xff]   ;;  %v4079_v31 = vld [vmem:[%s5436_s7 + $0x30c] ss:$16 sps:$4 sm:$0xff]  }
 0x220   :  { %2635 = vmatpush1.bf16.msra.mxu0 %v4020_v32  ;;  %2717 = vmatpush1.bf16.msra.mxu1 %v4023_v33  ;;  %v4074_v32 = vld [vmem:[%s5436_s7 + $0x300] ss:$16 sps:$4 sm:$0xff]   ;;  %v4077_v33 = vld [vmem:[%s5436_s7 + $0x308] ss:$16 sps:$4 sm:$0xff]  }
 0x221   :  { %2645 = vmatprep.subr.bf16.mxu0 %v4028_v34  ;;  %2727 = vmatprep.subr.bf16.mxu1 %v4031_v10  ;;  %v4082_v34 = vld [vmem:[%s5436_s7 + $0x324] ss:$16 sps:$4 sm:$0xff]   ;;  %v4085_v10 = vld [vmem:[%s5436_s7 + $0x32c] ss:$16 sps:$4 sm:$0xff]  }
 0x2b6   :  { %v1709_v41 = vpop.f32.mrb[8].mxu0  ;;  %v5131_v42 = vpop.f32.mrb[8].mxu1 }
 0x2b7   :  { %v3567_v43 = vadd.f32 %v1709_v41, %v977_v38  ;;  %v1711_v44 = vpop.f32.mrb[9].mxu0  ;;  %v1793_v45 = vpop.f32.mrb[9].mxu1  ;;  %v4080_v38 = vld [vmem:[%s5436_s7 + $0x320] ss:$16 sps:$4 sm:$0xff]   ;;  %v4091_v41 = vld [vmem:[%s5436_s7 + $0x34c] ss:$16 sps:$4 sm:$0xff]  }
 0x2b8   :  { %v3568_v46 = vadd.f32 %v1711_v44, %v981_v39  ;;  %v3570_v37 = vadd.f32 %v1793_v45, %v989_v40  ;;  %v1713_v47 = vpop.f32.mrb[10].mxu0  ;;  %v1795_v48 = vpop.f32.mrb[10].mxu1  ;;  %v4083_v39 = vld [vmem:[%s5436_s7 + $0x328] ss:$16 sps:$4 sm:$0xff]   ;;  %v4088_v40 = vld [vmem:[%s5436_s7 + $0x344] ss:$16 sps:$4 sm:$0xff]  }
 0x2b9   :  { %vm1798_vm6 = vcmp.gt.f32.partialorder %v3567_v43, 0.0  ;;  %v1802_v49 = vmul.f32 0.2, %v3567_v43  ;;  %v1714_v53 = vpop.f32.mrb[11].mxu0  ;;  %v1796_v54 = vpop.f32.mrb[11].mxu1 }
 0x2ba   :  { %vm1799_vm7 = vcmp.gt.f32.partialorder %v3568_v46, 0.0  ;;  %v1803_v50 = vmul.f32 0.2, %v3568_v46  ;;  %vm1801_vm8 = vcmp.gt.f32.partialorder %v3570_v37, 0.0  ;;  %v1805_v51 = vmul.f32 0.2, %v3570_v37 }
 0x2bb   :  { %v1806_v52 = vsel %vm1798_vm6, %v3567_v43, %v1802_v49  ;;  %v4086_v43 = vld [vmem:[%s5436_s7 + $0x340] ss:$16 sps:$4 sm:$0xff]   ;;  %v4089_v44 = vld [vmem:[%s5436_s7 + $0x348] ss:$16 sps:$4 sm:$0xff]   ;;  %v4094_v45 = vld [vmem:[%s5436_s7 + $0x364] ss:$16 sps:$4 sm:$0xff]   ;;  %v985_v54 = vrot.slane %v5123_v35, %v4721_v57 }
 0x2bc   :  { %v1807_v55 = vsel %vm1799_vm7, %v3568_v46, %v1803_v50  ;;  %v1809_v63 = vsel %vm1801_vm8, %v3570_v37, %v1805_v51  ;;  %v1810_v36 = vpack.c.bf16 %v1806_v52, %v1806_v52  ;;  %v4097_v46 = vld [vmem:[%s5436_s7 + $0x36c] ss:$16 sps:$4 sm:$0xff]   ;;  %v4092_v37 = vld [vmem:[%s5436_s7 + $0x360] ss:$16 sps:$4 sm:$0xff]   ;;  %v4095_v47 = vld [vmem:[%s5436_s7 + $0x368] ss:$16 sps:$4 sm:$0xff]  }
 0x2bd   :  { %v1811_v60 = vpack.c.bf16 %v1807_v55, %v1807_v55  ;;  %v1813_v2 = vpack.c.bf16 %v1809_v63, %v1809_v63  ;;  %v4100_v48 = vld [vmem:[%s5436_s7 + $0x384] ss:$16 sps:$4 sm:$0xff]   ;;  %v4103_v49 = vld [vmem:[%s5436_s7 + $0x38c] ss:$16 sps:$4 sm:$0xff]   ;;  %v4098_v50 = vld [vmem:[%s5436_s7 + $0x380] ss:$16 sps:$4 sm:$0xff]  }
 0x2be   :  { %v4101_v51 = vld [vmem:[%s5436_s7 + $0x388] ss:$16 sps:$4 sm:$0xff]   ;;  %v4106_v52 = vld [vmem:[%s5436_s7 + $0x3a4] ss:$16 sps:$4 sm:$0xff]   ;;  %v4109_v53 = vld [vmem:[%s5436_s7 + $0x3ac] ss:$16 sps:$4 sm:$0xff]  }
 0x2bf   :  { %2636 = vmatprep.mubr.bf16.mxu0 %v1811_v60  ;;  %2718 = vmatprep.mubr.bf16.mxu1 %v1811_v60  ;;  %v4104_v55 = vld [vmem:[%s5436_s7 + $0x3a0] ss:$16 sps:$4 sm:$0xff]   ;;  %v4107_v60 = vld [vmem:[%s5436_s7 + $0x3a8] ss:$16 sps:$4 sm:$0xff]   ;;  %v4115_v35 = vld [vmem:[%s5436_s7 + $0x3cc] ss:$16 sps:$4 sm:$0xff]  }
 0x2c0   :  { %2637 = vmatmul.mubr.bf16.vlgmr.msra.gmra.mrb[12].mxu0 %v1810_v36  ;;  %2719 = vmatmul.mubr.bf16.vlgmr.msra.gmra.mrb[12].mxu1 %v1810_v36  ;;  %v4110_v63 = vld [vmem:[%s5436_s7 + $0x3c0] ss:$16 sps:$4 sm:$0xff]   ;;  %v4113_v36 = vld [vmem:[%s5436_s7 + $0x3c8] ss:$16 sps:$4 sm:$0xff]  }
 0x2c1   :  { %2646 = vmatpush1.bf16.msra.mxu0 %v4026_v61  ;;  %2728 = vmatpush1.bf16.msra.mxu1 %v4029_v62  ;;  %v4112_v61 = vld [vmem:[%s5436_s7 + $0x3c4] ss:$16 sps:$4 sm:$0xff]   ;;  %v3569_v62 = vadd.f32 %v5131_v42, %v985_v54  ;;  %v4121_v42 = vld [vmem:[%s5436_s7 + $0x3ec] ss:$16 sps:$4 sm:$0xff]  }
 0x2c2   :  { %2677 = vmatprep.mubr.bf16.mxu0 %v1813_v2  ;;  %2759 = vmatprep.mubr.bf16.mxu1 %v1813_v2  ;;  %v4116_v2 = vld [vmem:[%s5436_s7 + $0x3e0] ss:$16 sps:$4 sm:$0xff]  }
 0x2c3   :  { %2647 = vmatprep.subr.bf16.mxu0 %v4034_v0  ;;  %2729 = vmatprep.subr.bf16.mxu1 %v4037_v1  ;;  %v4118_v0 = vld [vmem:[%s5436_s7 + $0x3e4] ss:$16 sps:$4 sm:$0xff]   ;;  %v1804_v1 = vmul.f32 0.2, %v3569_v62  ;;  %vm1800_vm9 = vcmp.gt.f32.partialorder %v3569_v62, 0.0 }
 0x2c5   :  { %2648 = vmatpush1.bf16.msra.mxu0 %v4032_v3  ;;  %2730 = vmatpush1.bf16.msra.mxu1 %v4035_v4  ;;  %v4119_v3 = vld [vmem:[%s5436_s7 + $0x3e8] ss:$16 sps:$4 sm:$0xff]   ;;  %v4122_v4 = vld [vmem:[%s5438_s9 + $0x40] sm:$0xff]  }
 0x2c6   :  { %2649 = vmatprep.subr.bf16.mxu0 %v4040_v5  ;;  %2731 = vmatprep.subr.bf16.mxu1 %v4043_v6  ;;  %v4123_v5 = vld [vmem:[%s5438_s9 + $0xc0] sm:$0xff]   ;;  %v1808_v6 = vsel %vm1800_vm9, %v3569_v62, %v1804_v1 }
 0x2c9   :  { %2650 = vmatpush1.bf16.msra.mxu0 %v4038_v7  ;;  %2732 = vmatpush1.bf16.msra.mxu1 %v4041_v8  ;;  %v4124_v7 = vld [vmem:[%s5438_s9] sm:$0xff]  }
 0x2ca   :  { %2651 = vmatprep.subr.bf16.mxu0 %v4046_v9  ;;  %2733 = vmatprep.subr.bf16.mxu1 %v4049_v11  ;;  %v4125_v8 = vld [vmem:[%s5438_s9 + $0x80] sm:$0xff]   ;;  %v1812_v9 = vpack.c.bf16 %v1808_v6, %v1808_v6  ;;  %v4126_v11 = vld [vmem:[%s5438_s9 + $0x48] sm:$0xff]  }
 0x2cd   :  { %2652 = vmatpush1.bf16.msra.mxu0 %v4044_v12  ;;  %2734 = vmatpush1.bf16.msra.mxu1 %v4047_v13  ;;  %v4127_v12 = vld [vmem:[%s5438_s9 + $0xc8] sm:$0xff]  }
 0x2ce   :  { %2653 = vmatprep.subr.bf16.mxu0 %v4052_v14  ;;  %2735 = vmatprep.subr.bf16.mxu1 %v4055_v15  ;;  %v4128_v13 = vld [vmem:[%s5438_s9 + $0x8] sm:$0xff]   ;;  %v4130_v15 = vld [vmem:[%s5438_s9 + $0x50] sm:$0xff]  }
 0x2cf   :  { %v4129_v14 = vld [vmem:[%s5438_s9 + $0x88] sm:$0xff]  }
 0x2d1   :  { %2654 = vmatpush1.bf16.msra.mxu0 %v4050_v16  ;;  %2736 = vmatpush1.bf16.msra.mxu1 %v4053_v17  ;;  %v4131_v16 = vld [vmem:[%s5438_s9 + $0xd0] sm:$0xff]  }
 0x2d2   :  { %2655 = vmatprep.subr.bf16.mxu0 %v4058_v18  ;;  %2737 = vmatprep.subr.bf16.mxu1 %v4061_v19  ;;  %v4132_v17 = vld [vmem:[%s5438_s9 + $0x10] sm:$0xff]   ;;  %v4134_v19 = vld [vmem:[%s5438_s9 + $0x58] sm:$0xff]  }
 0x2d3   :  { %v4133_v18 = vld [vmem:[%s5438_s9 + $0x90] sm:$0xff]  }
 0x2d5   :  { %2656 = vmatpush1.bf16.msra.mxu0 %v4056_v20  ;;  %2738 = vmatpush1.bf16.msra.mxu1 %v4059_v21  ;;  %v4135_v20 = vld [vmem:[%s5438_s9 + $0xd8] sm:$0xff]  }
 0x2d6   :  { %2657 = vmatprep.subr.bf16.mxu0 %v4064_v22  ;;  %2739 = vmatprep.subr.bf16.mxu1 %v4067_v23  ;;  %v4136_v21 = vld [vmem:[%s5438_s9 + $0x18] sm:$0xff]   ;;  %v4138_v23 = vld [vmem:[%s5438_s9 + $0x60] sm:$0xff]  }
 0x2d7   :  { %v4137_v22 = vld [vmem:[%s5438_s9 + $0x98] sm:$0xff]  }
 0x2d9   :  { %2658 = vmatpush1.bf16.msra.mxu0 %v4062_v24  ;;  %2740 = vmatpush1.bf16.msra.mxu1 %v4065_v25  ;;  %v4139_v24 = vld [vmem:[%s5438_s9 + $0xe0] sm:$0xff]  }
 0x2da   :  { %2659 = vmatprep.subr.bf16.mxu0 %v4070_v26  ;;  %2741 = vmatprep.subr.bf16.mxu1 %v4073_v27  ;;  %v4140_v25 = vld [vmem:[%s5438_s9 + $0x20] sm:$0xff]   ;;  %v4142_v27 = vld [vmem:[%s5438_s9 + $0x68] sm:$0xff]  }
 0x2db   :  { %v4141_v26 = vld [vmem:[%s5438_s9 + $0xa0] sm:$0xff]  }
 0x2dd   :  { %2660 = vmatpush1.bf16.msra.mxu0 %v4068_v28  ;;  %2742 = vmatpush1.bf16.msra.mxu1 %v4071_v29  ;;  %v4143_v28 = vld [vmem:[%s5438_s9 + $0xe8] sm:$0xff]  }
 0x2de   :  { %2661 = vmatprep.subr.bf16.mxu0 %v4076_v30  ;;  %2743 = vmatprep.subr.bf16.mxu1 %v4079_v31  ;;  %v4144_v29 = vld [vmem:[%s5438_s9 + $0x28] sm:$0xff]   ;;  %v4146_v31 = vld [vmem:[%s5438_s9 + $0x70] sm:$0xff]  }
 0x2df   :  { %v4145_v30 = vld [vmem:[%s5438_s9 + $0xa8] sm:$0xff]  }
 0x2e1   :  { %2662 = vmatpush1.bf16.msra.mxu0 %v4074_v32  ;;  %2744 = vmatpush1.bf16.msra.mxu1 %v4077_v33  ;;  %v4147_v32 = vld [vmem:[%s5438_s9 + $0xf0] sm:$0xff]  }
 0x2e2   :  { %2663 = vmatprep.subr.bf16.mxu0 %v4082_v34  ;;  %2745 = vmatprep.subr.bf16.mxu1 %v4085_v10  ;;  %v4148_v33 = vld [vmem:[%s5438_s9 + $0x30] sm:$0xff]   ;;  %v4150_v10 = vld [vmem:[%s5438_s9 + $0x78] sm:$0xff]  }
 0x2e3   :  { %v4149_v34 = vld [vmem:[%s5438_s9 + $0xb0] sm:$0xff]  }
 0x2e5   :  { %2664 = vmatpush1.bf16.msra.mxu0 %v4080_v38  ;;  %2746 = vmatpush1.bf16.msra.mxu1 %v4083_v39  ;;  %v4151_v38 = vld [vmem:[%s5438_s9 + $0xf8] sm:$0xff]  }
 0x2e6   :  { %2665 = vmatprep.subr.bf16.mxu0 %v4088_v40  ;;  %2747 = vmatprep.subr.bf16.mxu1 %v4091_v41  ;;  %v4152_v39 = vld [vmem:[%s5438_s9 + $0x38] sm:$0xff]   ;;  %v1942_v41 = vld [vmem:[%s5440_s8] sm:$0xf] }
 0x2e7   :  { %v4153_v40 = vld [vmem:[%s5438_s9 + $0xb8] sm:$0xff]  }
 0x2e9   :  { %2666 = vmatpush1.bf16.msra.mxu0 %v4086_v43  ;;  %2748 = vmatpush1.bf16.msra.mxu1 %v4089_v44  ;;  %v1947_v43 = vrot.slane %v1942_v41, %v4719_v56  ;;  %v1955_v44 = vrot.slane %v1942_v41, %v4721_v57 }
 0x2ea   :  { %2667 = vmatprep.subr.bf16.mxu0 %v4094_v45  ;;  %2749 = vmatprep.subr.bf16.mxu1 %v4097_v46  ;;  %v1951_v45 = vrot.slane %v1942_v41, %v4723_v58  ;;  %v1959_v46 = vrot.slane %v1942_v41, %v4725_v59 }
 0x2ed   :  { %2668 = vmatpush1.bf16.msra.mxu0 %v4092_v37  ;;  %2750 = vmatpush1.bf16.msra.mxu1 %v4095_v47 }
 0x2ee   :  { %2669 = vmatprep.subr.bf16.mxu0 %v4100_v48  ;;  %2751 = vmatprep.subr.bf16.mxu1 %v4103_v49 }
 0x2f1   :  { %2670 = vmatpush1.bf16.msra.mxu0 %v4098_v50  ;;  %2752 = vmatpush1.bf16.msra.mxu1 %v4101_v51 }
 0x2f2   :  { %2671 = vmatprep.subr.bf16.mxu0 %v4106_v52  ;;  %2753 = vmatprep.subr.bf16.mxu1 %v4109_v53 }
 0x2f5   :  { %2672 = vmatpush1.bf16.msra.mxu0 %v4104_v55  ;;  %2754 = vmatpush1.bf16.msra.mxu1 %v4107_v60 }
 0x2f6   :  { %2673 = vmatprep.subr.bf16.mxu0 %v4112_v61  ;;  %2755 = vmatprep.subr.bf16.mxu1 %v4115_v35 }
 0x2f9   :  { %2674 = vmatpush1.bf16.msra.mxu0 %v4110_v63  ;;  %2756 = vmatpush1.bf16.msra.mxu1 %v4113_v36 }
 0x2fa   :  { %2675 = vmatprep.subr.bf16.mxu0 %v4118_v0  ;;  %2757 = vmatprep.subr.bf16.mxu1 %v4121_v42 }
 0x2fd   :  { %2676 = vmatpush1.bf16.msra.mxu0 %v4116_v2  ;;  %2758 = vmatpush1.bf16.msra.mxu1 %v4119_v3 }
 0x2fe   :  { %3523 = vmatprep.subr.bf16.mxu0 %v4122_v4  ;;  %3545 = vmatprep.subr.bf16.mxu1 %v4123_v5  ;;  %v3490_v5 = vld [vmem:[%s5441_s10] ss:$0 sm:$0xff] }
 0x300   :  { %2678 = vmatmul.mubr.bf16.vlgmr.msra.gmra.mrb[12].mxu0 %v1812_v9  ;;  %2760 = vmatmul.mubr.bf16.vlgmr.msra.gmra.mrb[12].mxu1 %v1812_v9 }
 0x301   :  { %3524 = vmatpush3.bf16.msra.mxu0 %v4124_v7  ;;  %3546 = vmatpush3.bf16.msra.mxu1 %v4125_v8 }
 0x302   :  { %3525 = vmatprep.subr.bf16.mxu0 %v4126_v11  ;;  %3547 = vmatprep.subr.bf16.mxu1 %v4127_v12 }
 0x305   :  { %3526 = vmatpush3.bf16.msra.mxu0 %v4128_v13  ;;  %3548 = vmatpush3.bf16.msra.mxu1 %v4129_v14 }
 0x306   :  { %3527 = vmatprep.subr.bf16.mxu0 %v4130_v15  ;;  %3549 = vmatprep.subr.bf16.mxu1 %v4131_v16 }
 0x309   :  { %3528 = vmatpush3.bf16.msra.mxu0 %v4132_v17  ;;  %3550 = vmatpush3.bf16.msra.mxu1 %v4133_v18 }
 0x30a   :  { %3529 = vmatprep.subr.bf16.mxu0 %v4134_v19  ;;  %3551 = vmatprep.subr.bf16.mxu1 %v4135_v20 }
 0x30d   :  { %3530 = vmatpush3.bf16.msra.mxu0 %v4136_v21  ;;  %3552 = vmatpush3.bf16.msra.mxu1 %v4137_v22 }
 0x30e   :  { %3531 = vmatprep.subr.bf16.mxu0 %v4138_v23  ;;  %3553 = vmatprep.subr.bf16.mxu1 %v4139_v24 }
 0x311   :  { %3532 = vmatpush3.bf16.msra.mxu0 %v4140_v25  ;;  %3554 = vmatpush3.bf16.msra.mxu1 %v4141_v26 }
 0x312   :  { %3533 = vmatprep.subr.bf16.mxu0 %v4142_v27  ;;  %3555 = vmatprep.subr.bf16.mxu1 %v4143_v28 }
 0x315   :  { %3534 = vmatpush3.bf16.msra.mxu0 %v4144_v29  ;;  %3556 = vmatpush3.bf16.msra.mxu1 %v4145_v30 }
 0x316   :  { %3535 = vmatprep.subr.bf16.mxu0 %v4146_v31  ;;  %3557 = vmatprep.subr.bf16.mxu1 %v4147_v32 }
 0x319   :  { %3536 = vmatpush3.bf16.msra.mxu0 %v4148_v33  ;;  %3558 = vmatpush3.bf16.msra.mxu1 %v4149_v34 }
 0x31a   :  { %3537 = vmatprep.subr.bf16.mxu0 %v4150_v10  ;;  %3559 = vmatprep.subr.bf16.mxu1 %v4151_v38 }
 0x31d   :  { %3538 = vmatpush3.bf16.msra.mxu0 %v4152_v39  ;;  %3560 = vmatpush3.bf16.msra.mxu1 %v4153_v40 }
 0x3d3   :  { %v2679_v37 = vpop.f32.mrb[12].mxu0  ;;  %v2761_v47 = vpop.f32.mrb[12].mxu1 }
 0x3d4   :  { %v3571_v48 = vadd.f32 %v2679_v37, %v1947_v43  ;;  %v3573_v49 = vadd.f32 %v2761_v47, %v1955_v44  ;;  %v2681_v50 = vpop.f32.mrb[13].mxu0  ;;  %v2763_v51 = vpop.f32.mrb[13].mxu1 }
 0x3d5   :  { %v3572_v52 = vadd.f32 %v2681_v50, %v1951_v45  ;;  %v3574_v53 = vadd.f32 %v2763_v51, %v1959_v46  ;;  %v2683_v54 = vpop.f32.mrb[14].mxu0  ;;  %v2765_v55 = vpop.f32.mrb[14].mxu1 }
 0x3d6   :  { %vm2768_vm10 = vcmp.gt.f32.partialorder %v3571_v48, 0.0  ;;  %v2772_v60 = vmul.f32 0.2, %v3571_v48  ;;  %vm2770_vm11 = vcmp.gt.f32.partialorder %v3573_v49, 0.0  ;;  %v2774_v56 = vmul.f32 0.2, %v3573_v49 }
 0x3d7   :  { %vm2769_vm12 = vcmp.gt.f32.partialorder %v3572_v52, 0.0  ;;  %v2773_v57 = vmul.f32 0.2, %v3572_v52  ;;  %vm2771_vm13 = vcmp.gt.f32.partialorder %v3574_v53, 0.0  ;;  %v2775_v58 = vmul.f32 0.2, %v3574_v53 }
 0x3d8   :  { %v2776_v61 = vsel %vm2768_vm10, %v3571_v48, %v2772_v60  ;;  %v2778_v59 = vsel %vm2770_vm11, %v3573_v49, %v2774_v56  ;;  %v2684_v35 = vpop.f32.mrb[15].mxu0  ;;  %v2766_v62 = vpop.f32.mrb[15].mxu1 }
 0x3d9   :  { %v2777_v63 = vsel %vm2769_vm12, %v3572_v52, %v2773_v57  ;;  %v2779_v36 = vsel %vm2771_vm13, %v3574_v53, %v2775_v58  ;;  %v2780_v1 = vpack.c.bf16 %v2776_v61, %v2776_v61  ;;  %v2782_v2 = vpack.c.bf16 %v2778_v59, %v2778_v59 }
 0x3da   :  { %v2781_v0 = vpack.c.bf16 %v2777_v63, %v2777_v63  ;;  %v2783_v42 = vpack.c.bf16 %v2779_v36, %v2779_v36 }
 0x3dc   :  { %3079 = vmatprep.mubr.bf16.mxu0 %v2781_v0  ;;  %3119 = vmatprep.mubr.bf16.mxu1 %v2783_v42 }
 0x3dd   :  { %3080 = vmatmul.mubr.bf16.vlgmr.msra.gmra.mrb[16].mxu0 %v2780_v1  ;;  %3120 = vmatmul.mubr.bf16.vlgmr.msra.gmra.mrb[16].mxu1 %v2782_v2 }
 0x4b0   :  { %v3539_v3 = vpop.f32.mrb[16].mxu0  ;;  %v3561_v4 = vpop.f32.mrb[16].mxu1 }
 0x4b1   :  { %v3540_v6 = vpop.f32.mrb[17].mxu0  ;;  %v3562_v7 = vpop.f32.mrb[17].mxu1 }
 0x4b2   :  { %v3541_v8 = vadd.f32 %v3540_v6, %v3539_v3  ;;  %v3563_v9 = vadd.f32 %v3562_v7, %v3561_v4  ;;  %v3542_v11 = vpop.f32.mrb[18].mxu0  ;;  %v3564_v12 = vpop.f32.mrb[18].mxu1 }
 0x4b3   :  { %v3543_v13 = vpop.f32.mrb[19].mxu0  ;;  %v3565_v14 = vpop.f32.mrb[19].mxu1 }
 0x4b4   :  { %v3082_v15 = vadd.f32 %v3541_v8, %v3490_v5 }
 0x4b6   :  { %v3122_v16 = vadd.f32 %v3563_v9, %v3082_v15 }
 0x4b8   :  { %3128 = vst.msk [vmem:[%s5442_s11] sm:$0x3] %vm3127_vm14, %v3122_v16 }

</bundles_post_ra>
